<compile_context>
chip_gen: v5e
topology: v5e:2x2
jax: 0.10.0
libtpu: 0.0.40
codegen_flags: <defaults>
</compile_context>

<pallas_src>
import functools

import jax
import jax.numpy as jnp
from jax import lax
from jax.experimental import pallas as pl
from jax.experimental.pallas import tpu as pltpu


_VMEM_LIMIT = 32 * 1024 * 1024   # explicit; safe on v5e/v6e/v7x, blocks are far smaller


# -----------------------------------------------------------------------------
# Pallas kernels
# -----------------------------------------------------------------------------
def _fused_matmul_kernel(*refs, relu, has_residual):
    """out[co, n] = relu?((W @ P)[co, n] * scale[co] + shift[co]) (+ residual[co, n]).

    W block (Cout, K) bf16 resident; P block (K, tile_n) bf16 lane-dense;
    scale/shift (Cout, 1) f32; residual/out (Cout, tile_n) f32.
    """
    if has_residual:
        w_ref, p_ref, scale_ref, shift_ref, res_ref, o_ref = refs
    else:
        w_ref, p_ref, scale_ref, shift_ref, o_ref = refs
        res_ref = None
    acc = jnp.dot(w_ref[...], p_ref[...], preferred_element_type=jnp.float32)
    out = acc * scale_ref[...] + shift_ref[...]
    if relu:
        out = jnp.maximum(out, 0.0)
    if res_ref is not None:
        out = out + res_ref[...]
    o_ref[...] = out.astype(o_ref.dtype)


def fused_matmul_t(wmat, patches, scale, shift, *, relu, residual=None, tile_n=512):
    """Transposed fused matmul: (Cout, K) @ (K, N) + per-row affine (+ReLU, +residual).

    The pixel axis N sits on the lane axis for both loads and stores (lane-dense).
    Weights/patches are cast to bf16 (f32 MXU accumulation); epilogue is f32.
    No padding of N: ragged last blocks are handled by the Pallas grid.
    """
    Cout, K = wmat.shape
    K2, N = patches.shape
    assert K == K2
    tile = N if N <= tile_n else tile_n          # tile_n is a multiple of 128
    grid = (pl.cdiv(N, tile),)

    w_b = wmat.astype(jnp.bfloat16)
    p_b = patches.astype(jnp.bfloat16)
    scale2 = scale.reshape(Cout, 1).astype(jnp.float32)
    shift2 = shift.reshape(Cout, 1).astype(jnp.float32)

    in_specs = [
        pl.BlockSpec((Cout, K), lambda j: (0, 0)),     # resident weights
        pl.BlockSpec((K, tile), lambda j: (0, j)),     # streamed patches (lane-dense)
        pl.BlockSpec((Cout, 1), lambda j: (0, 0)),
        pl.BlockSpec((Cout, 1), lambda j: (0, 0)),
    ]
    args = [w_b, p_b, scale2, shift2]
    if residual is not None:
        in_specs.append(pl.BlockSpec((Cout, tile), lambda j: (0, j)))
        args.append(residual.astype(jnp.float32))

    return pl.pallas_call(
        functools.partial(_fused_matmul_kernel, relu=relu,
                          has_residual=residual is not None),
        out_shape=jax.ShapeDtypeStruct((Cout, N), jnp.float32),
        grid=grid,
        in_specs=in_specs,
        out_specs=pl.BlockSpec((Cout, tile), lambda j: (0, j)),
        compiler_params=pltpu.CompilerParams(
            dimension_semantics=("parallel",),
            vmem_limit_bytes=_VMEM_LIMIT),
    )(*args)


def _attn_proj_kernel(x_ref, q_ref, w_ref, b_ref, o_ref, *, inv_hw):
    """Attention pooling over HW + final 1x1 Conv1d projection, one grid step.

    x: (BT, HW, C) f32; q: (1, 1, C); w: (C, Cout); b: (1, Cout); out: (BT, Cout).
    """
    x = x_ref[...]
    s = jnp.sum(x * q_ref[...], axis=-1, keepdims=True)      # (BT, HW, 1) == x @ q
    s = s - jnp.max(s, axis=1, keepdims=True)
    e = jnp.exp(s)
    p = e / jnp.sum(e, axis=1, keepdims=True)                 # softmax over HW
    pooled = jnp.sum(x * p, axis=1) * inv_hw                  # (BT, C)
    y = jnp.dot(pooled, w_ref[...], preferred_element_type=jnp.float32) + b_ref[...]
    o_ref[...] = y.astype(o_ref.dtype)


def attention_pool_project(xbt, q_att, w_out, b_out):
    """xbt: (B*T, HW, C) -> (B*T, Cout). Fused attention pool + out_layer."""
    BT, HW, C = xbt.shape
    Cout = w_out.shape[0]
    q3 = q_att.reshape(1, 1, C).astype(jnp.float32)
    wmat = w_out[:, :, 0].T.astype(jnp.float32)               # (C, Cout)
    b2 = b_out.reshape(1, Cout).astype(jnp.float32)
    return pl.pallas_call(
        functools.partial(_attn_proj_kernel, inv_hw=1.0 / float(HW)),
        out_shape=jax.ShapeDtypeStruct((BT, Cout), jnp.float32),
        grid=(1,),
        in_specs=[
            pl.BlockSpec((BT, HW, C), lambda i: (0, 0, 0)),
            pl.BlockSpec((1, 1, C), lambda i: (0, 0, 0)),
            pl.BlockSpec((C, Cout), lambda i: (0, 0)),
            pl.BlockSpec((1, Cout), lambda i: (0, 0)),
        ],
        out_specs=pl.BlockSpec((BT, Cout), lambda i: (0, 0)),
        compiler_params=pltpu.CompilerParams(
            dimension_semantics=("arbitrary",),
            vmem_limit_bytes=_VMEM_LIMIT),
    )(xbt.astype(jnp.float32), q3, wmat, b2)


# -----------------------------------------------------------------------------
# Layer wrappers (glue in plain JAX, matmul hot path in Pallas)
# -----------------------------------------------------------------------------
def conv3d_bn_relu(x, w, bn_scale, bn_shift, *, stride):
    """Conv3d(k=3, stride=(1,s,s), pad=1, bias=False) + BN(eval) + ReLU.

    x: (Cin, B, T, H, W) channels-first-flat; w: (Cout, Cin, 3, 3, 3)
    -> (Cout, B, T, Hout, Wout)
    """
    Cin, B, T, H, W = x.shape
    Cout = w.shape[0]
    Hout = (H + 2 - 3) // stride + 1
    Wout = (W + 2 - 3) // stride + 1
    xp = jnp.pad(x, ((0, 0), (0, 0), (1, 1), (1, 1), (1, 1)))
    taps = []
    for kt in range(3):
        for kh in range(3):
            for kw in range(3):
                taps.append(
                    xp[:, :, kt:kt + T,
                       kh:kh + stride * (Hout - 1) + 1:stride,
                       kw:kw + stride * (Wout - 1) + 1:stride])
    # (Cin, 27, B, T, Hout, Wout) -> (Cin*27, N); tap index is minor next to Cin,
    # which matches w.reshape(Cout, Cin*27).
    # TODO(synk): replace this bf16 im2col materialization with an in-kernel
    # 27-tap accumulation (tap grid axis + VMEM f32 accumulator).
    patches = jnp.stack(taps, axis=1).reshape(Cin * 27, B * T * Hout * Wout)
    wmat = w.reshape(Cout, Cin * 27)
    y = fused_matmul_t(wmat, patches, bn_scale, bn_shift, relu=True)
    return y.reshape(Cout, B, T, Hout, Wout)


def maxpool3d_133_s22(x):
    """MaxPool3d(kernel=(1,3,3), stride=(1,2,2), padding=(0,1,1)) on (C,B,T,H,W)."""
    C, B, T, H, W = x.shape
    Hout = (H + 2 - 3) // 2 + 1
    Wout = (W + 2 - 3) // 2 + 1
    xp = jnp.pad(x, ((0, 0), (0, 0), (0, 0), (1, 1), (1, 1)),
                 constant_values=-jnp.inf)
    out = None
    for kh in range(3):
        for kw in range(3):
            v = xp[:, :, :,
                   kh:kh + 2 * (Hout - 1) + 1:2,
                   kw:kw + 2 * (Wout - 1) + 1:2]
            out = v if out is None else jnp.maximum(out, v)
    return out


def res_block(p, x, *, stride):
    out = conv3d_bn_relu(x, *p["conv_a"], stride=stride)
    out = conv3d_bn_relu(out, *p["conv_b"], stride=1)
    if stride > 1:
        x = maxpool3d_133_s22(x)
    if p.get("adjust") is not None:
        # Fused: 1x1x1 adjust conv (+bias) + residual add, one Pallas call.
        w_adj, b_adj = p["adjust"]
        Cout = out.shape[0]
        Cin = x.shape[0]
        y = fused_matmul_t(
            w_adj.reshape(Cout, Cin),
            x.reshape(Cin, -1),
            jnp.ones((Cout,), jnp.float32),
            b_adj,
            relu=False,
            residual=out.reshape(Cout, -1))
        return y.reshape(out.shape)
    return out + x


# -----------------------------------------------------------------------------
# Full model
# -----------------------------------------------------------------------------
def resnet3d_vtp_forward(params, x):
    """x: (B, C, H, W, T) -> ((B, out_channels, T), fmaps[8] in NCDHW)."""
    # Internal layout (C, B, T, H, W): lane-dense pixel axis for every matmul.
    h = x.transpose(1, 0, 4, 2, 3)
    fmaps = []

    def record(a):
        t = jnp.swapaxes(a, 0, 1)        # -> (B, C, T, H, W) only at the boundary
        fmaps.append(t)
        fmaps.append(t)                  # following nn.Dropout (eval) is identity

    h = conv3d_bn_relu(h, *params["conv1"], stride=2); record(h)
    h = res_block(params["res1"], h, stride=2); record(h)
    h = res_block(params["res2"], h, stride=2); record(h)
    h = conv3d_bn_relu(h, *params["conv2"], stride=1); record(h)

    # TODO(synk): Encoder(2, 4, inner*8) definition not provided; treated as identity.
    C, B, T, H, W = h.shape
    xbt = h.transpose(1, 2, 3, 4, 0).reshape(B * T, H * W, C)
    w_out, b_out = params["out_layer"]
    y = attention_pool_project(xbt, params["q_att"], w_out, b_out)   # (B*T, Cout)
    y = y.reshape(B, T, -1).transpose(0, 2, 1)                       # (B, Cout, T)
    return y, fmaps


# -----------------------------------------------------------------------------
# Deterministic parameter init (PyTorch shapes; BN in eval form)
# -----------------------------------------------------------------------------
def init_params(key, in_channels, out_channels, inner):
    keys = iter(jax.random.split(key, 32))

    def conv_w(ci, co, k=3):
        return 0.1 * jax.random.normal(next(keys), (co, ci, k, k, k), jnp.float32)

    def bn_affine(co, eps=1e-5):
        gamma = jnp.ones((co,), jnp.float32)
        beta = jnp.zeros((co,), jnp.float32)
        mean = jnp.zeros((co,), jnp.float32)
        var = jnp.ones((co,), jnp.float32)
        scale = gamma / jnp.sqrt(var + eps)
        shift = beta - mean * scale
        return scale, shift

    def normal_conv(ci, co):
        s, sh = bn_affine(co)
        return (conv_w(ci, co), s, sh)

    def res_block_p(ci, co):
        return {
            "conv_a": normal_conv(ci, co),
            "conv_b": normal_conv(co, co),
            "adjust": (conv_w(ci, co, 1),
                       0.1 * jax.random.normal(next(keys), (co,), jnp.float32)),
        }

    c8 = inner * 8
    return {
        "conv1": normal_conv(in_channels, inner),
        "res1": res_block_p(inner, inner * 2),
        "res2": res_block_p(inner * 2, inner * 4),
        "conv2": normal_conv(inner * 4, c8),
        "q_att": jax.random.normal(next(keys), (c8, 1), jnp.float32),
        "out_layer": (0.1 * jax.random.normal(next(keys), (out_channels, c8, 1), jnp.float32),
                      0.1 * jax.random.normal(next(keys), (out_channels,), jnp.float32)),
    }


# -----------------------------------------------------------------------------
# Pure-JAX reference (for correctness check only)
# -----------------------------------------------------------------------------
def reference_forward(params, x):
    x = x.transpose(0, 1, 4, 2, 3)
    fmaps = []

    def nc(x, prm, stride):
        w, s, sh = prm
        y = lax.conv_general_dilated(
            x, w, (1, stride, stride), ((1, 1), (1, 1), (1, 1)),
            dimension_numbers=("NCDHW", "OIDHW", "NCDHW"),
            precision=lax.Precision.HIGHEST)
        y = y * s[None, :, None, None, None] + sh[None, :, None, None, None]
        return jnp.maximum(y, 0.0)

    def rb(x, p, stride):
        out = nc(x, p["conv_a"], stride)
        out = nc(out, p["conv_b"], 1)
        xs = lax.reduce_window(x, -jnp.inf, lax.max, (1, 1, 1, 3, 3), (1, 1, 1, 2, 2),
                               ((0, 0), (0, 0), (0, 0), (1, 1), (1, 1)))
        wa, ba = p["adjust"]
        xs = lax.conv_general_dilated(
            xs, wa, (1, 1, 1), ((0, 0), (0, 0), (0, 0)),
            dimension_numbers=("NCDHW", "OIDHW", "NCDHW"),
            precision=lax.Precision.HIGHEST) + ba[None, :, None, None, None]
        return out + xs

    x = nc(x, params["conv1"], 2); fmaps += [x, x]
    x = rb(x, params["res1"], 2); fmaps += [x, x]
    x = rb(x, params["res2"], 2); fmaps += [x, x]
    x = nc(x, params["conv2"], 1); fmaps += [x, x]

    xt = x.transpose(0, 2, 3, 4, 1)
    B, T, H, W, C = xt.shape
    xr = xt.reshape(B, T, H * W, C)
    a_t = xr @ params["q_att"]
    a_t = jax.nn.softmax(a_t, axis=-2)
    pooled = jnp.squeeze(jnp.swapaxes(xr, -1, -2) @ a_t, -1) / (H * W)
    w_out, b_out = params["out_layer"]
    y = jnp.einsum("btc,oc->bot", pooled, w_out[:, :, 0],
                   precision=lax.Precision.HIGHEST) + b_out[None, :, None]
    return y, fmaps


# -----------------------------------------------------------------------------
if __name__ == "__main__":
    key = jax.random.PRNGKey(0)
    pkey, xkey = jax.random.split(key)

    in_channels, out_channels, inner = 3, 10, 4
    params = init_params(pkey, in_channels, out_channels, inner)

    B, H, W, T = 2, 16, 16, 4
    x = jax.random.normal(xkey, (B, in_channels, H, W, T), jnp.float32)

    y, fmaps = jax.jit(resnet3d_vtp_forward)(params, x)
    jax.block_until_ready(y)

    y_ref, fmaps_ref = reference_forward(params, x)

    assert y.shape == (B, out_channels, T), y.shape
    assert len(fmaps) == 8
    assert fmaps[-1].shape == fmaps_ref[-1].shape, (fmaps[-1].shape, fmaps_ref[-1].shape)
    # Tolerance allows bf16 MXU inputs (f32 accumulation) through 6 stacked convs.
    assert jnp.allclose(fmaps[-1], fmaps_ref[-1], rtol=5e-2, atol=1e-1), float(
        jnp.max(jnp.abs(fmaps[-1] - fmaps_ref[-1])))
    assert jnp.allclose(y, y_ref, rtol=5e-2, atol=1e-1), float(
        jnp.max(jnp.abs(y - y_ref)))

    print("KERNEL_OK")
</pallas_src>

<mosaic_0001>
module attributes {stable_mosaic.version = 11 : i64} {
  func.func @_fused_matmul_kernel(%arg0: i32, %arg1: memref<4x81xbf16, #tpu.memory_space<vmem>>, %arg2: memref<81x512xbf16, #tpu.memory_space<vmem>>, %arg3: memref<4x1xf32, #tpu.memory_space<vmem>>, %arg4: memref<4x1xf32, #tpu.memory_space<vmem>>, %arg5: memref<4x512xf32, #tpu.memory_space<vmem>>) attributes {dimension_semantics = [#tpu.dimension_semantics<parallel>], iteration_bounds = array<i64: 1>, scalar_prefetch = 0 : i64, scratch_operands = 0 : i64, tpu.core_type = #tpu.core_type<tc>, window_params = [{pipeline_mode = #tpu.pipeline_mode<synchronous>, transform_indices = @transform_0, window_bounds = array<i64: 4, 81>}, {transform_indices = @transform_1, window_bounds = array<i64: 81, 512>}, {pipeline_mode = #tpu.pipeline_mode<synchronous>, transform_indices = @transform_2, window_bounds = array<i64: 4, 1>}, {pipeline_mode = #tpu.pipeline_mode<synchronous>, transform_indices = @transform_3, window_bounds = array<i64: 4, 1>}, {transform_indices = @transform_4, window_bounds = array<i64: 4, 512>}]} {
    %c0 = arith.constant 0 : index
    %c0_0 = arith.constant 0 : index
    %0 = vector.load %arg1[%c0, %c0_0] : memref<4x81xbf16, #tpu.memory_space<vmem>>, vector<4x81xbf16>
    %c0_1 = arith.constant 0 : index
    %c0_2 = arith.constant 0 : index
    %1 = vector.load %arg2[%c0_1, %c0_2] : memref<81x512xbf16, #tpu.memory_space<vmem>>, vector<81x512xbf16>
    %cst = arith.constant dense<0.000000e+00> : vector<4x512xf32>
    %2 = tpu.matmul %0, %1, %cst {dimension_numbers = #tpu.dot_dimension_numbers<[1], [0], [0], [1], [0, 0, 1, 1], [], []>} : vector<4x81xbf16>, vector<81x512xbf16>, vector<4x512xf32> -> vector<4x512xf32>
    %c0_3 = arith.constant 0 : index
    %c0_4 = arith.constant 0 : index
    %3 = vector.load %arg3[%c0_3, %c0_4] : memref<4x1xf32, #tpu.memory_space<vmem>>, vector<4x1xf32>
    %4 = vector.broadcast %3 : vector<4x1xf32> to vector<4x512xf32>
    %5 = arith.mulf %2, %4 : vector<4x512xf32>
    %c0_5 = arith.constant 0 : index
    %c0_6 = arith.constant 0 : index
    %6 = vector.load %arg4[%c0_5, %c0_6] : memref<4x1xf32, #tpu.memory_space<vmem>>, vector<4x1xf32>
    %7 = vector.broadcast %6 : vector<4x1xf32> to vector<4x512xf32>
    %8 = arith.addf %5, %7 : vector<4x512xf32>
    %cst_7 = arith.constant 0.000000e+00 : f32
    %9 = vector.broadcast %cst_7 : f32 to vector<4x512xf32>
    %10 = arith.maximumf %8, %9 : vector<4x512xf32>
    %c0_8 = arith.constant 0 : index
    %c0_9 = arith.constant 0 : index
    %11 = vector.load %arg5[%c0_8, %c0_9] : memref<4x512xf32, #tpu.memory_space<vmem>>, vector<4x512xf32>
    tpu.vector_store %arg5[%c0_8, %c0_9], %10 {strides = array<i32>} : memref<4x512xf32, #tpu.memory_space<vmem>>, vector<4x512xf32>,
    return
  }
  func.func @transform_0(%arg0: i32) -> (i32, i32) {
    %c0_i32 = arith.constant 0 : i32
    %c0_i32_0 = arith.constant 0 : i32
    %c0_i32_1 = arith.constant 0 : i32
    return %c0_i32, %c0_i32_0 : i32, i32
  }
  func.func @transform_1(%arg0: i32) -> (i32, i32) {
    %c0_i32 = arith.constant 0 : i32
    %c0_i32_0 = arith.constant 0 : i32
    return %c0_i32, %arg0 : i32, i32
  }
  func.func @transform_2(%arg0: i32) -> (i32, i32) {
    %c0_i32 = arith.constant 0 : i32
    %c0_i32_0 = arith.constant 0 : i32
    %c0_i32_1 = arith.constant 0 : i32
    return %c0_i32, %c0_i32_0 : i32, i32
  }
  func.func @transform_3(%arg0: i32) -> (i32, i32) {
    %c0_i32 = arith.constant 0 : i32
    %c0_i32_0 = arith.constant 0 : i32
    %c0_i32_1 = arith.constant 0 : i32
    return %c0_i32, %c0_i32_0 : i32, i32
  }
  func.func @transform_4(%arg0: i32) -> (i32, i32) {
    %c0_i32 = arith.constant 0 : i32
    %c0_i32_0 = arith.constant 0 : i32
    return %c0_i32, %arg0 : i32, i32
  }
}

module attributes {stable_mosaic.version = 11 : i64} {
  func.func @_fused_matmul_kernel(%arg0: i32, %arg1: memref<8x108xbf16, #tpu.memory_space<vmem>>, %arg2: memref<108x128xbf16, #tpu.memory_space<vmem>>, %arg3: memref<8x1xf32, #tpu.memory_space<vmem>>, %arg4: memref<8x1xf32, #tpu.memory_space<vmem>>, %arg5: memref<8x128xf32, #tpu.memory_space<vmem>>) attributes {dimension_semantics = [#tpu.dimension_semantics<parallel>], iteration_bounds = array<i64: 1>, scalar_prefetch = 0 : i64, scratch_operands = 0 : i64, tpu.core_type = #tpu.core_type<tc>, window_params = [{pipeline_mode = #tpu.pipeline_mode<synchronous>, transform_indices = @transform_0, window_bounds = array<i64: 8, 108>}, {transform_indices = @transform_1, window_bounds = array<i64: 108, 128>}, {pipeline_mode = #tpu.pipeline_mode<synchronous>, transform_indices = @transform_2, window_bounds = array<i64: 8, 1>}, {pipeline_mode = #tpu.pipeline_mode<synchronous>, transform_indices = @transform_3, window_bounds = array<i64: 8, 1>}, {transform_indices = @transform_4, window_bounds = array<i64: 8, 128>}]} {
    %c0 = arith.constant 0 : index
    %c0_0 = arith.constant 0 : index
    %0 = vector.load %arg1[%c0, %c0_0] : memref<8x108xbf16, #tpu.memory_space<vmem>>, vector<8x108xbf16>
    %c0_1 = arith.constant 0 : index
    %c0_2 = arith.constant 0 : index
    %1 = vector.load %arg2[%c0_1, %c0_2] : memref<108x128xbf16, #tpu.memory_space<vmem>>, vector<108x128xbf16>
    %cst = arith.constant dense<0.000000e+00> : vector<8x128xf32>
    %2 = tpu.matmul %0, %1, %cst {dimension_numbers = #tpu.dot_dimension_numbers<[1], [0], [0], [1], [0, 0, 1, 1], [], []>} : vector<8x108xbf16>, vector<108x128xbf16>, vector<8x128xf32> -> vector<8x128xf32>
    %c0_3 = arith.constant 0 : index
    %c0_4 = arith.constant 0 : index
    %3 = vector.load %arg3[%c0_3, %c0_4] : memref<8x1xf32, #tpu.memory_space<vmem>>, vector<8x1xf32>
    %4 = vector.broadcast %3 : vector<8x1xf32> to vector<8x128xf32>
    %5 = arith.mulf %2, %4 : vector<8x128xf32>
    %c0_5 = arith.constant 0 : index
    %c0_6 = arith.constant 0 : index
    %6 = vector.load %arg4[%c0_5, %c0_6] : memref<8x1xf32, #tpu.memory_space<vmem>>, vector<8x1xf32>
    %7 = vector.broadcast %6 : vector<8x1xf32> to vector<8x128xf32>
    %8 = arith.addf %5, %7 : vector<8x128xf32>
    %cst_7 = arith.constant 0.000000e+00 : f32
    %9 = vector.broadcast %cst_7 : f32 to vector<8x128xf32>
    %10 = arith.maximumf %8, %9 : vector<8x128xf32>
    %c0_8 = arith.constant 0 : index
    %c0_9 = arith.constant 0 : index
    %11 = vector.load %arg5[%c0_8, %c0_9] : memref<8x128xf32, #tpu.memory_space<vmem>>, vector<8x128xf32>
    tpu.vector_store %arg5[%c0_8, %c0_9], %10 {strides = array<i32>} : memref<8x128xf32, #tpu.memory_space<vmem>>, vector<8x128xf32>,
    return
  }
  func.func @transform_0(%arg0: i32) -> (i32, i32) {
    %c0_i32 = arith.constant 0 : i32
    %c0_i32_0 = arith.constant 0 : i32
    %c0_i32_1 = arith.constant 0 : i32
    return %c0_i32, %c0_i32_0 : i32, i32
  }
  func.func @transform_1(%arg0: i32) -> (i32, i32) {
    %c0_i32 = arith.constant 0 : i32
    %c0_i32_0 = arith.constant 0 : i32
    return %c0_i32, %arg0 : i32, i32
  }
  func.func @transform_2(%arg0: i32) -> (i32, i32) {
    %c0_i32 = arith.constant 0 : i32
    %c0_i32_0 = arith.constant 0 : i32
    %c0_i32_1 = arith.constant 0 : i32
    return %c0_i32, %c0_i32_0 : i32, i32
  }
  func.func @transform_3(%arg0: i32) -> (i32, i32) {
    %c0_i32 = arith.constant 0 : i32
    %c0_i32_0 = arith.constant 0 : i32
    %c0_i32_1 = arith.constant 0 : i32
    return %c0_i32, %c0_i32_0 : i32, i32
  }
  func.func @transform_4(%arg0: i32) -> (i32, i32) {
    %c0_i32 = arith.constant 0 : i32
    %c0_i32_0 = arith.constant 0 : i32
    return %c0_i32, %arg0 : i32, i32
  }
}

module attributes {stable_mosaic.version = 11 : i64} {
  func.func @_fused_matmul_kernel(%arg0: i32, %arg1: memref<8x216xbf16, #tpu.memory_space<vmem>>, %arg2: memref<216x128xbf16, #tpu.memory_space<vmem>>, %arg3: memref<8x1xf32, #tpu.memory_space<vmem>>, %arg4: memref<8x1xf32, #tpu.memory_space<vmem>>, %arg5: memref<8x128xf32, #tpu.memory_space<vmem>>) attributes {dimension_semantics = [#tpu.dimension_semantics<parallel>], iteration_bounds = array<i64: 1>, scalar_prefetch = 0 : i64, scratch_operands = 0 : i64, tpu.core_type = #tpu.core_type<tc>, window_params = [{pipeline_mode = #tpu.pipeline_mode<synchronous>, transform_indices = @transform_0, window_bounds = array<i64: 8, 216>}, {transform_indices = @transform_1, window_bounds = array<i64: 216, 128>}, {pipeline_mode = #tpu.pipeline_mode<synchronous>, transform_indices = @transform_2, window_bounds = array<i64: 8, 1>}, {pipeline_mode = #tpu.pipeline_mode<synchronous>, transform_indices = @transform_3, window_bounds = array<i64: 8, 1>}, {transform_indices = @transform_4, window_bounds = array<i64: 8, 128>}]} {
    %c0 = arith.constant 0 : index
    %c0_0 = arith.constant 0 : index
    %0 = vector.load %arg1[%c0, %c0_0] : memref<8x216xbf16, #tpu.memory_space<vmem>>, vector<8x216xbf16>
    %c0_1 = arith.constant 0 : index
    %c0_2 = arith.constant 0 : index
    %1 = vector.load %arg2[%c0_1, %c0_2] : memref<216x128xbf16, #tpu.memory_space<vmem>>, vector<216x128xbf16>
    %cst = arith.constant dense<0.000000e+00> : vector<8x128xf32>
    %2 = tpu.matmul %0, %1, %cst {dimension_numbers = #tpu.dot_dimension_numbers<[1], [0], [0], [1], [0, 0, 1, 1], [], []>} : vector<8x216xbf16>, vector<216x128xbf16>, vector<8x128xf32> -> vector<8x128xf32>
    %c0_3 = arith.constant 0 : index
    %c0_4 = arith.constant 0 : index
    %3 = vector.load %arg3[%c0_3, %c0_4] : memref<8x1xf32, #tpu.memory_space<vmem>>, vector<8x1xf32>
    %4 = vector.broadcast %3 : vector<8x1xf32> to vector<8x128xf32>
    %5 = arith.mulf %2, %4 : vector<8x128xf32>
    %c0_5 = arith.constant 0 : index
    %c0_6 = arith.constant 0 : index
    %6 = vector.load %arg4[%c0_5, %c0_6] : memref<8x1xf32, #tpu.memory_space<vmem>>, vector<8x1xf32>
    %7 = vector.broadcast %6 : vector<8x1xf32> to vector<8x128xf32>
    %8 = arith.addf %5, %7 : vector<8x128xf32>
    %cst_7 = arith.constant 0.000000e+00 : f32
    %9 = vector.broadcast %cst_7 : f32 to vector<8x128xf32>
    %10 = arith.maximumf %8, %9 : vector<8x128xf32>
    %c0_8 = arith.constant 0 : index
    %c0_9 = arith.constant 0 : index
    %11 = vector.load %arg5[%c0_8, %c0_9] : memref<8x128xf32, #tpu.memory_space<vmem>>, vector<8x128xf32>
    tpu.vector_store %arg5[%c0_8, %c0_9], %10 {strides = array<i32>} : memref<8x128xf32, #tpu.memory_space<vmem>>, vector<8x128xf32>,
    return
  }
  func.func @transform_0(%arg0: i32) -> (i32, i32) {
    %c0_i32 = arith.constant 0 : i32
    %c0_i32_0 = arith.constant 0 : i32
    %c0_i32_1 = arith.constant 0 : i32
    return %c0_i32, %c0_i32_0 : i32, i32
  }
  func.func @transform_1(%arg0: i32) -> (i32, i32) {
    %c0_i32 = arith.constant 0 : i32
    %c0_i32_0 = arith.constant 0 : i32
    return %c0_i32, %arg0 : i32, i32
  }
  func.func @transform_2(%arg0: i32) -> (i32, i32) {
    %c0_i32 = arith.constant 0 : i32
    %c0_i32_0 = arith.constant 0 : i32
    %c0_i32_1 = arith.constant 0 : i32
    return %c0_i32, %c0_i32_0 : i32, i32
  }
  func.func @transform_3(%arg0: i32) -> (i32, i32) {
    %c0_i32 = arith.constant 0 : i32
    %c0_i32_0 = arith.constant 0 : i32
    %c0_i32_1 = arith.constant 0 : i32
    return %c0_i32, %c0_i32_0 : i32, i32
  }
  func.func @transform_4(%arg0: i32) -> (i32, i32) {
    %c0_i32 = arith.constant 0 : i32
    %c0_i32_0 = arith.constant 0 : i32
    return %c0_i32, %arg0 : i32, i32
  }
}

module attributes {stable_mosaic.version = 11 : i64} {
  func.func @_fused_matmul_kernel(%arg0: i32, %arg1: memref<8x4xbf16, #tpu.memory_space<vmem>>, %arg2: memref<4x128xbf16, #tpu.memory_space<vmem>>, %arg3: memref<8x1xf32, #tpu.memory_space<vmem>>, %arg4: memref<8x1xf32, #tpu.memory_space<vmem>>, %arg5: memref<8x128xf32, #tpu.memory_space<vmem>>, %arg6: memref<8x128xf32, #tpu.memory_space<vmem>>) attributes {dimension_semantics = [#tpu.dimension_semantics<parallel>], iteration_bounds = array<i64: 1>, scalar_prefetch = 0 : i64, scratch_operands = 0 : i64, tpu.core_type = #tpu.core_type<tc>, window_params = [{pipeline_mode = #tpu.pipeline_mode<synchronous>, transform_indices = @transform_0, window_bounds = array<i64: 8, 4>}, {transform_indices = @transform_1, window_bounds = array<i64: 4, 128>}, {pipeline_mode = #tpu.pipeline_mode<synchronous>, transform_indices = @transform_2, window_bounds = array<i64: 8, 1>}, {pipeline_mode = #tpu.pipeline_mode<synchronous>, transform_indices = @transform_3, window_bounds = array<i64: 8, 1>}, {transform_indices = @transform_4, window_bounds = array<i64: 8, 128>}, {transform_indices = @transform_5, window_bounds = array<i64: 8, 128>}]} {
    %c0 = arith.constant 0 : index
    %c0_0 = arith.constant 0 : index
    %0 = vector.load %arg1[%c0, %c0_0] : memref<8x4xbf16, #tpu.memory_space<vmem>>, vector<8x4xbf16>
    %c0_1 = arith.constant 0 : index
    %c0_2 = arith.constant 0 : index
    %1 = vector.load %arg2[%c0_1, %c0_2] : memref<4x128xbf16, #tpu.memory_space<vmem>>, vector<4x128xbf16>
    %cst = arith.constant dense<0.000000e+00> : vector<8x128xf32>
    %2 = tpu.matmul %0, %1, %cst {dimension_numbers = #tpu.dot_dimension_numbers<[1], [0], [0], [1], [0, 0, 1, 1], [], []>} : vector<8x4xbf16>, vector<4x128xbf16>, vector<8x128xf32> -> vector<8x128xf32>
    %c0_3 = arith.constant 0 : index
    %c0_4 = arith.constant 0 : index
    %3 = vector.load %arg3[%c0_3, %c0_4] : memref<8x1xf32, #tpu.memory_space<vmem>>, vector<8x1xf32>
    %4 = vector.broadcast %3 : vector<8x1xf32> to vector<8x128xf32>
    %5 = arith.mulf %2, %4 : vector<8x128xf32>
    %c0_5 = arith.constant 0 : index
    %c0_6 = arith.constant 0 : index
    %6 = vector.load %arg4[%c0_5, %c0_6] : memref<8x1xf32, #tpu.memory_space<vmem>>, vector<8x1xf32>
    %7 = vector.broadcast %6 : vector<8x1xf32> to vector<8x128xf32>
    %8 = arith.addf %5, %7 : vector<8x128xf32>
    %c0_7 = arith.constant 0 : index
    %c0_8 = arith.constant 0 : index
    %9 = vector.load %arg5[%c0_7, %c0_8] : memref<8x128xf32, #tpu.memory_space<vmem>>, vector<8x128xf32>
    %10 = arith.addf %8, %9 : vector<8x128xf32>
    %c0_9 = arith.constant 0 : index
    %c0_10 = arith.constant 0 : index
    %11 = vector.load %arg6[%c0_9, %c0_10] : memref<8x128xf32, #tpu.memory_space<vmem>>, vector<8x128xf32>
    tpu.vector_store %arg6[%c0_9, %c0_10], %10 {strides = array<i32>} : memref<8x128xf32, #tpu.memory_space<vmem>>, vector<8x128xf32>,
    return
  }
  func.func @transform_0(%arg0: i32) -> (i32, i32) {
    %c0_i32 = arith.constant 0 : i32
    %c0_i32_0 = arith.constant 0 : i32
    %c0_i32_1 = arith.constant 0 : i32
    return %c0_i32, %c0_i32_0 : i32, i32
  }
  func.func @transform_1(%arg0: i32) -> (i32, i32) {
    %c0_i32 = arith.constant 0 : i32
    %c0_i32_0 = arith.constant 0 : i32
    return %c0_i32, %arg0 : i32, i32
  }
  func.func @transform_2(%arg0: i32) -> (i32, i32) {
    %c0_i32 = arith.constant 0 : i32
    %c0_i32_0 = arith.constant 0 : i32
    %c0_i32_1 = arith.constant 0 : i32
    return %c0_i32, %c0_i32_0 : i32, i32
  }
  func.func @transform_3(%arg0: i32) -> (i32, i32) {
    %c0_i32 = arith.constant 0 : i32
    %c0_i32_0 = arith.constant 0 : i32
    %c0_i32_1 = arith.constant 0 : i32
    return %c0_i32, %c0_i32_0 : i32, i32
  }
  func.func @transform_4(%arg0: i32) -> (i32, i32) {
    %c0_i32 = arith.constant 0 : i32
    %c0_i32_0 = arith.constant 0 : i32
    return %c0_i32, %arg0 : i32, i32
  }
  func.func @transform_5(%arg0: i32) -> (i32, i32) {
    %c0_i32 = arith.constant 0 : i32
    %c0_i32_0 = arith.constant 0 : i32
    return %c0_i32, %arg0 : i32, i32
  }
}

module attributes {stable_mosaic.version = 11 : i64} {
  func.func @_fused_matmul_kernel(%arg0: i32, %arg1: memref<16x216xbf16, #tpu.memory_space<vmem>>, %arg2: memref<216x32xbf16, #tpu.memory_space<vmem>>, %arg3: memref<16x1xf32, #tpu.memory_space<vmem>>, %arg4: memref<16x1xf32, #tpu.memory_space<vmem>>, %arg5: memref<16x32xf32, #tpu.memory_space<vmem>>) attributes {dimension_semantics = [#tpu.dimension_semantics<parallel>], iteration_bounds = array<i64: 1>, scalar_prefetch = 0 : i64, scratch_operands = 0 : i64, tpu.core_type = #tpu.core_type<tc>, window_params = [{pipeline_mode = #tpu.pipeline_mode<synchronous>, transform_indices = @transform_0, window_bounds = array<i64: 16, 216>}, {transform_indices = @transform_1, window_bounds = array<i64: 216, 32>}, {pipeline_mode = #tpu.pipeline_mode<synchronous>, transform_indices = @transform_2, window_bounds = array<i64: 16, 1>}, {pipeline_mode = #tpu.pipeline_mode<synchronous>, transform_indices = @transform_3, window_bounds = array<i64: 16, 1>}, {transform_indices = @transform_4, window_bounds = array<i64: 16, 32>}]} {
    %c0 = arith.constant 0 : index
    %c0_0 = arith.constant 0 : index
    %0 = vector.load %arg1[%c0, %c0_0] : memref<16x216xbf16, #tpu.memory_space<vmem>>, vector<16x216xbf16>
    %c0_1 = arith.constant 0 : index
    %c0_2 = arith.constant 0 : index
    %1 = vector.load %arg2[%c0_1, %c0_2] : memref<216x32xbf16, #tpu.memory_space<vmem>>, vector<216x32xbf16>
    %cst = arith.constant dense<0.000000e+00> : vector<16x32xf32>
    %2 = tpu.matmul %0, %1, %cst {dimension_numbers = #tpu.dot_dimension_numbers<[1], [0], [0], [1], [0, 0, 1, 1], [], []>} : vector<16x216xbf16>, vector<216x32xbf16>, vector<16x32xf32> -> vector<16x32xf32>
    %c0_3 = arith.constant 0 : index
    %c0_4 = arith.constant 0 : index
    %3 = vector.load %arg3[%c0_3, %c0_4] : memref<16x1xf32, #tpu.memory_space<vmem>>, vector<16x1xf32>
    %4 = vector.broadcast %3 : vector<16x1xf32> to vector<16x32xf32>
    %5 = arith.mulf %2, %4 : vector<16x32xf32>
    %c0_5 = arith.constant 0 : index
    %c0_6 = arith.constant 0 : index
    %6 = vector.load %arg4[%c0_5, %c0_6] : memref<16x1xf32, #tpu.memory_space<vmem>>, vector<16x1xf32>
    %7 = vector.broadcast %6 : vector<16x1xf32> to vector<16x32xf32>
    %8 = arith.addf %5, %7 : vector<16x32xf32>
    %cst_7 = arith.constant 0.000000e+00 : f32
    %9 = vector.broadcast %cst_7 : f32 to vector<16x32xf32>
    %10 = arith.maximumf %8, %9 : vector<16x32xf32>
    %c0_8 = arith.constant 0 : index
    %c0_9 = arith.constant 0 : index
    %11 = vector.load %arg5[%c0_8, %c0_9] : memref<16x32xf32, #tpu.memory_space<vmem>>, vector<16x32xf32>
    tpu.vector_store %arg5[%c0_8, %c0_9], %10 {strides = array<i32>} : memref<16x32xf32, #tpu.memory_space<vmem>>, vector<16x32xf32>,
    return
  }
  func.func @transform_0(%arg0: i32) -> (i32, i32) {
    %c0_i32 = arith.constant 0 : i32
    %c0_i32_0 = arith.constant 0 : i32
    %c0_i32_1 = arith.constant 0 : i32
    return %c0_i32, %c0_i32_0 : i32, i32
  }
  func.func @transform_1(%arg0: i32) -> (i32, i32) {
    %c0_i32 = arith.constant 0 : i32
    %c0_i32_0 = arith.constant 0 : i32
    return %c0_i32, %arg0 : i32, i32
  }
  func.func @transform_2(%arg0: i32) -> (i32, i32) {
    %c0_i32 = arith.constant 0 : i32
    %c0_i32_0 = arith.constant 0 : i32
    %c0_i32_1 = arith.constant 0 : i32
    return %c0_i32, %c0_i32_0 : i32, i32
  }
  func.func @transform_3(%arg0: i32) -> (i32, i32) {
    %c0_i32 = arith.constant 0 : i32
    %c0_i32_0 = arith.constant 0 : i32
    %c0_i32_1 = arith.constant 0 : i32
    return %c0_i32, %c0_i32_0 : i32, i32
  }
  func.func @transform_4(%arg0: i32) -> (i32, i32) {
    %c0_i32 = arith.constant 0 : i32
    %c0_i32_0 = arith.constant 0 : i32
    return %c0_i32, %arg0 : i32, i32
  }
}

module attributes {stable_mosaic.version = 11 : i64} {
  func.func @_fused_matmul_kernel(%arg0: i32, %arg1: memref<16x432xbf16, #tpu.memory_space<vmem>>, %arg2: memref<432x32xbf16, #tpu.memory_space<vmem>>, %arg3: memref<16x1xf32, #tpu.memory_space<vmem>>, %arg4: memref<16x1xf32, #tpu.memory_space<vmem>>, %arg5: memref<16x32xf32, #tpu.memory_space<vmem>>) attributes {dimension_semantics = [#tpu.dimension_semantics<parallel>], iteration_bounds = array<i64: 1>, scalar_prefetch = 0 : i64, scratch_operands = 0 : i64, tpu.core_type = #tpu.core_type<tc>, window_params = [{pipeline_mode = #tpu.pipeline_mode<synchronous>, transform_indices = @transform_0, window_bounds = array<i64: 16, 432>}, {transform_indices = @transform_1, window_bounds = array<i64: 432, 32>}, {pipeline_mode = #tpu.pipeline_mode<synchronous>, transform_indices = @transform_2, window_bounds = array<i64: 16, 1>}, {pipeline_mode = #tpu.pipeline_mode<synchronous>, transform_indices = @transform_3, window_bounds = array<i64: 16, 1>}, {transform_indices = @transform_4, window_bounds = array<i64: 16, 32>}]} {
    %c0 = arith.constant 0 : index
    %c0_0 = arith.constant 0 : index
    %0 = vector.load %arg1[%c0, %c0_0] : memref<16x432xbf16, #tpu.memory_space<vmem>>, vector<16x432xbf16>
    %c0_1 = arith.constant 0 : index
    %c0_2 = arith.constant 0 : index
    %1 = vector.load %arg2[%c0_1, %c0_2] : memref<432x32xbf16, #tpu.memory_space<vmem>>, vector<432x32xbf16>
    %cst = arith.constant dense<0.000000e+00> : vector<16x32xf32>
    %2 = tpu.matmul %0, %1, %cst {dimension_numbers = #tpu.dot_dimension_numbers<[1], [0], [0], [1], [0, 0, 1, 1], [], []>} : vector<16x432xbf16>, vector<432x32xbf16>, vector<16x32xf32> -> vector<16x32xf32>
    %c0_3 = arith.constant 0 : index
    %c0_4 = arith.constant 0 : index
    %3 = vector.load %arg3[%c0_3, %c0_4] : memref<16x1xf32, #tpu.memory_space<vmem>>, vector<16x1xf32>
    %4 = vector.broadcast %3 : vector<16x1xf32> to vector<16x32xf32>
    %5 = arith.mulf %2, %4 : vector<16x32xf32>
    %c0_5 = arith.constant 0 : index
    %c0_6 = arith.constant 0 : index
    %6 = vector.load %arg4[%c0_5, %c0_6] : memref<16x1xf32, #tpu.memory_space<vmem>>, vector<16x1xf32>
    %7 = vector.broadcast %6 : vector<16x1xf32> to vector<16x32xf32>
    %8 = arith.addf %5, %7 : vector<16x32xf32>
    %cst_7 = arith.constant 0.000000e+00 : f32
    %9 = vector.broadcast %cst_7 : f32 to vector<16x32xf32>
    %10 = arith.maximumf %8, %9 : vector<16x32xf32>
    %c0_8 = arith.constant 0 : index
    %c0_9 = arith.constant 0 : index
    %11 = vector.load %arg5[%c0_8, %c0_9] : memref<16x32xf32, #tpu.memory_space<vmem>>, vector<16x32xf32>
    tpu.vector_store %arg5[%c0_8, %c0_9], %10 {strides = array<i32>} : memref<16x32xf32, #tpu.memory_space<vmem>>, vector<16x32xf32>,
    return
  }
  func.func @transform_0(%arg0: i32) -> (i32, i32) {
    %c0_i32 = arith.constant 0 : i32
    %c0_i32_0 = arith.constant 0 : i32
    %c0_i32_1 = arith.constant 0 : i32
    return %c0_i32, %c0_i32_0 : i32, i32
  }
  func.func @transform_1(%arg0: i32) -> (i32, i32) {
    %c0_i32 = arith.constant 0 : i32
    %c0_i32_0 = arith.constant 0 : i32
    return %c0_i32, %arg0 : i32, i32
  }
  func.func @transform_2(%arg0: i32) -> (i32, i32) {
    %c0_i32 = arith.constant 0 : i32
    %c0_i32_0 = arith.constant 0 : i32
    %c0_i32_1 = arith.constant 0 : i32
    return %c0_i32, %c0_i32_0 : i32, i32
  }
  func.func @transform_3(%arg0: i32) -> (i32, i32) {
    %c0_i32 = arith.constant 0 : i32
    %c0_i32_0 = arith.constant 0 : i32
    %c0_i32_1 = arith.constant 0 : i32
    return %c0_i32, %c0_i32_0 : i32, i32
  }
  func.func @transform_4(%arg0: i32) -> (i32, i32) {
    %c0_i32 = arith.constant 0 : i32
    %c0_i32_0 = arith.constant 0 : i32
    return %c0_i32, %arg0 : i32, i32
  }
}

module attributes {stable_mosaic.version = 11 : i64} {
  func.func @_fused_matmul_kernel(%arg0: i32, %arg1: memref<16x8xbf16, #tpu.memory_space<vmem>>, %arg2: memref<8x32xbf16, #tpu.memory_space<vmem>>, %arg3: memref<16x1xf32, #tpu.memory_space<vmem>>, %arg4: memref<16x1xf32, #tpu.memory_space<vmem>>, %arg5: memref<16x32xf32, #tpu.memory_space<vmem>>, %arg6: memref<16x32xf32, #tpu.memory_space<vmem>>) attributes {dimension_semantics = [#tpu.dimension_semantics<parallel>], iteration_bounds = array<i64: 1>, scalar_prefetch = 0 : i64, scratch_operands = 0 : i64, tpu.core_type = #tpu.core_type<tc>, window_params = [{pipeline_mode = #tpu.pipeline_mode<synchronous>, transform_indices = @transform_0, window_bounds = array<i64: 16, 8>}, {transform_indices = @transform_1, window_bounds = array<i64: 8, 32>}, {pipeline_mode = #tpu.pipeline_mode<synchronous>, transform_indices = @transform_2, window_bounds = array<i64: 16, 1>}, {pipeline_mode = #tpu.pipeline_mode<synchronous>, transform_indices = @transform_3, window_bounds = array<i64: 16, 1>}, {transform_indices = @transform_4, window_bounds = array<i64: 16, 32>}, {transform_indices = @transform_5, window_bounds = array<i64: 16, 32>}]} {
    %c0 = arith.constant 0 : index
    %c0_0 = arith.constant 0 : index
    %0 = vector.load %arg1[%c0, %c0_0] : memref<16x8xbf16, #tpu.memory_space<vmem>>, vector<16x8xbf16>
    %c0_1 = arith.constant 0 : index
    %c0_2 = arith.constant 0 : index
    %1 = vector.load %arg2[%c0_1, %c0_2] : memref<8x32xbf16, #tpu.memory_space<vmem>>, vector<8x32xbf16>
    %cst = arith.constant dense<0.000000e+00> : vector<16x32xf32>
    %2 = tpu.matmul %0, %1, %cst {dimension_numbers = #tpu.dot_dimension_numbers<[1], [0], [0], [1], [0, 0, 1, 1], [], []>} : vector<16x8xbf16>, vector<8x32xbf16>, vector<16x32xf32> -> vector<16x32xf32>
    %c0_3 = arith.constant 0 : index
    %c0_4 = arith.constant 0 : index
    %3 = vector.load %arg3[%c0_3, %c0_4] : memref<16x1xf32, #tpu.memory_space<vmem>>, vector<16x1xf32>
    %4 = vector.broadcast %3 : vector<16x1xf32> to vector<16x32xf32>
    %5 = arith.mulf %2, %4 : vector<16x32xf32>
    %c0_5 = arith.constant 0 : index
    %c0_6 = arith.constant 0 : index
    %6 = vector.load %arg4[%c0_5, %c0_6] : memref<16x1xf32, #tpu.memory_space<vmem>>, vector<16x1xf32>
    %7 = vector.broadcast %6 : vector<16x1xf32> to vector<16x32xf32>
    %8 = arith.addf %5, %7 : vector<16x32xf32>
    %c0_7 = arith.constant 0 : index
    %c0_8 = arith.constant 0 : index
    %9 = vector.load %arg5[%c0_7, %c0_8] : memref<16x32xf32, #tpu.memory_space<vmem>>, vector<16x32xf32>
    %10 = arith.addf %8, %9 : vector<16x32xf32>
    %c0_9 = arith.constant 0 : index
    %c0_10 = arith.constant 0 : index
    %11 = vector.load %arg6[%c0_9, %c0_10] : memref<16x32xf32, #tpu.memory_space<vmem>>, vector<16x32xf32>
    tpu.vector_store %arg6[%c0_9, %c0_10], %10 {strides = array<i32>} : memref<16x32xf32, #tpu.memory_space<vmem>>, vector<16x32xf32>,
    return
  }
  func.func @transform_0(%arg0: i32) -> (i32, i32) {
    %c0_i32 = arith.constant 0 : i32
    %c0_i32_0 = arith.constant 0 : i32
    %c0_i32_1 = arith.constant 0 : i32
    return %c0_i32, %c0_i32_0 : i32, i32
  }
  func.func @transform_1(%arg0: i32) -> (i32, i32) {
    %c0_i32 = arith.constant 0 : i32
    %c0_i32_0 = arith.constant 0 : i32
    return %c0_i32, %arg0 : i32, i32
  }
  func.func @transform_2(%arg0: i32) -> (i32, i32) {
    %c0_i32 = arith.constant 0 : i32
    %c0_i32_0 = arith.constant 0 : i32
    %c0_i32_1 = arith.constant 0 : i32
    return %c0_i32, %c0_i32_0 : i32, i32
  }
  func.func @transform_3(%arg0: i32) -> (i32, i32) {
    %c0_i32 = arith.constant 0 : i32
    %c0_i32_0 = arith.constant 0 : i32
    %c0_i32_1 = arith.constant 0 : i32
    return %c0_i32, %c0_i32_0 : i32, i32
  }
  func.func @transform_4(%arg0: i32) -> (i32, i32) {
    %c0_i32 = arith.constant 0 : i32
    %c0_i32_0 = arith.constant 0 : i32
    return %c0_i32, %arg0 : i32, i32
  }
  func.func @transform_5(%arg0: i32) -> (i32, i32) {
    %c0_i32 = arith.constant 0 : i32
    %c0_i32_0 = arith.constant 0 : i32
    return %c0_i32, %arg0 : i32, i32
  }
}

module attributes {stable_mosaic.version = 11 : i64} {
  func.func @_fused_matmul_kernel(%arg0: i32, %arg1: memref<32x432xbf16, #tpu.memory_space<vmem>>, %arg2: memref<432x32xbf16, #tpu.memory_space<vmem>>, %arg3: memref<32x1xf32, #tpu.memory_space<vmem>>, %arg4: memref<32x1xf32, #tpu.memory_space<vmem>>, %arg5: memref<32x32xf32, #tpu.memory_space<vmem>>) attributes {dimension_semantics = [#tpu.dimension_semantics<parallel>], iteration_bounds = array<i64: 1>, scalar_prefetch = 0 : i64, scratch_operands = 0 : i64, tpu.core_type = #tpu.core_type<tc>, window_params = [{pipeline_mode = #tpu.pipeline_mode<synchronous>, transform_indices = @transform_0, window_bounds = array<i64: 32, 432>}, {transform_indices = @transform_1, window_bounds = array<i64: 432, 32>}, {pipeline_mode = #tpu.pipeline_mode<synchronous>, transform_indices = @transform_2, window_bounds = array<i64: 32, 1>}, {pipeline_mode = #tpu.pipeline_mode<synchronous>, transform_indices = @transform_3, window_bounds = array<i64: 32, 1>}, {transform_indices = @transform_4, window_bounds = array<i64: 32, 32>}]} {
    %c0 = arith.constant 0 : index
    %c0_0 = arith.constant 0 : index
    %0 = vector.load %arg1[%c0, %c0_0] : memref<32x432xbf16, #tpu.memory_space<vmem>>, vector<32x432xbf16>
    %c0_1 = arith.constant 0 : index
    %c0_2 = arith.constant 0 : index
    %1 = vector.load %arg2[%c0_1, %c0_2] : memref<432x32xbf16, #tpu.memory_space<vmem>>, vector<432x32xbf16>
    %cst = arith.constant dense<0.000000e+00> : vector<32x32xf32>
    %2 = tpu.matmul %0, %1, %cst {dimension_numbers = #tpu.dot_dimension_numbers<[1], [0], [0], [1], [0, 0, 1, 1], [], []>} : vector<32x432xbf16>, vector<432x32xbf16>, vector<32x32xf32> -> vector<32x32xf32>
    %c0_3 = arith.constant 0 : index
    %c0_4 = arith.constant 0 : index
    %3 = vector.load %arg3[%c0_3, %c0_4] : memref<32x1xf32, #tpu.memory_space<vmem>>, vector<32x1xf32>
    %4 = vector.broadcast %3 : vector<32x1xf32> to vector<32x32xf32>
    %5 = arith.mulf %2, %4 : vector<32x32xf32>
    %c0_5 = arith.constant 0 : index
    %c0_6 = arith.constant 0 : index
    %6 = vector.load %arg4[%c0_5, %c0_6] : memref<32x1xf32, #tpu.memory_space<vmem>>, vector<32x1xf32>
    %7 = vector.broadcast %6 : vector<32x1xf32> to vector<32x32xf32>
    %8 = arith.addf %5, %7 : vector<32x32xf32>
    %cst_7 = arith.constant 0.000000e+00 : f32
    %9 = vector.broadcast %cst_7 : f32 to vector<32x32xf32>
    %10 = arith.maximumf %8, %9 : vector<32x32xf32>
    %c0_8 = arith.constant 0 : index
    %c0_9 = arith.constant 0 : index
    %11 = vector.load %arg5[%c0_8, %c0_9] : memref<32x32xf32, #tpu.memory_space<vmem>>, vector<32x32xf32>
    tpu.vector_store %arg5[%c0_8, %c0_9], %10 {strides = array<i32>} : memref<32x32xf32, #tpu.memory_space<vmem>>, vector<32x32xf32>,
    return
  }
  func.func @transform_0(%arg0: i32) -> (i32, i32) {
    %c0_i32 = arith.constant 0 : i32
    %c0_i32_0 = arith.constant 0 : i32
    %c0_i32_1 = arith.constant 0 : i32
    return %c0_i32, %c0_i32_0 : i32, i32
  }
  func.func @transform_1(%arg0: i32) -> (i32, i32) {
    %c0_i32 = arith.constant 0 : i32
    %c0_i32_0 = arith.constant 0 : i32
    return %c0_i32, %arg0 : i32, i32
  }
  func.func @transform_2(%arg0: i32) -> (i32, i32) {
    %c0_i32 = arith.constant 0 : i32
    %c0_i32_0 = arith.constant 0 : i32
    %c0_i32_1 = arith.constant 0 : i32
    return %c0_i32, %c0_i32_0 : i32, i32
  }
  func.func @transform_3(%arg0: i32) -> (i32, i32) {
    %c0_i32 = arith.constant 0 : i32
    %c0_i32_0 = arith.constant 0 : i32
    %c0_i32_1 = arith.constant 0 : i32
    return %c0_i32, %c0_i32_0 : i32, i32
  }
  func.func @transform_4(%arg0: i32) -> (i32, i32) {
    %c0_i32 = arith.constant 0 : i32
    %c0_i32_0 = arith.constant 0 : i32
    return %c0_i32, %arg0 : i32, i32
  }
}

module attributes {stable_mosaic.version = 11 : i64} {
  func.func @_attn_proj_kernel(%arg0: i32, %arg1: memref<8x4x32xf32, #tpu.memory_space<vmem>>, %arg2: memref<1x1x32xf32, #tpu.memory_space<vmem>>, %arg3: memref<32x10xf32, #tpu.memory_space<vmem>>, %arg4: memref<1x10xf32, #tpu.memory_space<vmem>>, %arg5: memref<8x10xf32, #tpu.memory_space<vmem>>) attributes {dimension_semantics = [#tpu.dimension_semantics<arbitrary>], iteration_bounds = array<i64: 1>, scalar_prefetch = 0 : i64, scratch_operands = 0 : i64, tpu.core_type = #tpu.core_type<tc>, window_params = [{pipeline_mode = #tpu.pipeline_mode<synchronous>, transform_indices = @transform_0, window_bounds = array<i64: 8, 4, 32>}, {pipeline_mode = #tpu.pipeline_mode<synchronous>, transform_indices = @transform_1, window_bounds = array<i64: 1, 1, 32>}, {pipeline_mode = #tpu.pipeline_mode<synchronous>, transform_indices = @transform_2, window_bounds = array<i64: 32, 10>}, {pipeline_mode = #tpu.pipeline_mode<synchronous>, transform_indices = @transform_3, window_bounds = array<i64: 1, 10>}, {pipeline_mode = #tpu.pipeline_mode<synchronous>, transform_indices = @transform_4, window_bounds = array<i64: 8, 10>}]} {
    %c0 = arith.constant 0 : index
    %c0_0 = arith.constant 0 : index
    %c0_1 = arith.constant 0 : index
    %0 = vector.load %arg1[%c0, %c0_0, %c0_1] : memref<8x4x32xf32, #tpu.memory_space<vmem>>, vector<8x4x32xf32>
    %c0_2 = arith.constant 0 : index
    %c0_3 = arith.constant 0 : index
    %c0_4 = arith.constant 0 : index
    %1 = vector.load %arg2[%c0_2, %c0_3, %c0_4] : memref<1x1x32xf32, #tpu.memory_space<vmem>>, vector<1x1x32xf32>
    %2 = vector.broadcast %1 : vector<1x1x32xf32> to vector<8x4x32xf32>
    %3 = arith.mulf %0, %2 : vector<8x4x32xf32>
    %cst = arith.constant dense<0.000000e+00> : vector<8x4xf32>
    %4 = vector.multi_reduction <add>, %3, %cst [2] : vector<8x4x32xf32> to vector<8x4xf32>
    %5 = vector.shape_cast %4 : vector<8x4xf32> to vector<8x4x1xf32>
    %cst_5 = arith.constant dense<0xFF800000> : vector<8x1xf32>
    %6 = vector.multi_reduction <maximumf>, %5, %cst_5 [1] : vector<8x4x1xf32> to vector<8x1xf32>
    %7 = vector.shape_cast %6 : vector<8x1xf32> to vector<8x1x1xf32>
    %8 = vector.broadcast %7 : vector<8x1x1xf32> to vector<8x4x1xf32>
    %9 = arith.subf %5, %8 : vector<8x4x1xf32>
    %10 = math.exp %9 : vector<8x4x1xf32>
    %cst_6 = arith.constant dense<0.000000e+00> : vector<8x1xf32>
    %11 = vector.multi_reduction <add>, %10, %cst_6 [1] : vector<8x4x1xf32> to vector<8x1xf32>
    %12 = vector.shape_cast %11 : vector<8x1xf32> to vector<8x1x1xf32>
    %13 = vector.broadcast %12 : vector<8x1x1xf32> to vector<8x4x1xf32>
    %14 = arith.divf %10, %13 : vector<8x4x1xf32>
    %15 = vector.broadcast %14 : vector<8x4x1xf32> to vector<8x4x32xf32>
    %16 = arith.mulf %0, %15 : vector<8x4x32xf32>
    %cst_7 = arith.constant dense<0.000000e+00> : vector<8x32xf32>
    %17 = vector.multi_reduction <add>, %16, %cst_7 [1] : vector<8x4x32xf32> to vector<8x32xf32>
    %cst_8 = arith.constant 2.500000e-01 : f32
    %18 = vector.broadcast %cst_8 : f32 to vector<8x32xf32>
    %19 = arith.mulf %17, %18 : vector<8x32xf32>
    %c0_9 = arith.constant 0 : index
    %c0_10 = arith.constant 0 : index
    %20 = vector.load %arg3[%c0_9, %c0_10] : memref<32x10xf32, #tpu.memory_space<vmem>>, vector<32x10xf32>
    %cst_11 = arith.constant dense<0.000000e+00> : vector<8x10xf32>
    %21 = tpu.matmul %19, %20, %cst_11 {dimension_numbers = #tpu.dot_dimension_numbers<[1], [0], [0], [1], [0, 0, 1, 1], [], []>} : vector<8x32xf32>, vector<32x10xf32>, vector<8x10xf32> -> vector<8x10xf32>
    %c0_12 = arith.constant 0 : index
    %c0_13 = arith.constant 0 : index
    %22 = vector.load %arg4[%c0_12, %c0_13] : memref<1x10xf32, #tpu.memory_space<vmem>>, vector<1x10xf32>
    %23 = vector.broadcast %22 : vector<1x10xf32> to vector<8x10xf32>
    %24 = arith.addf %21, %23 : vector<8x10xf32>
    %c0_14 = arith.constant 0 : index
    %c0_15 = arith.constant 0 : index
    %25 = vector.load %arg5[%c0_14, %c0_15] : memref<8x10xf32, #tpu.memory_space<vmem>>, vector<8x10xf32>
    tpu.vector_store %arg5[%c0_14, %c0_15], %24 {strides = array<i32>} : memref<8x10xf32, #tpu.memory_space<vmem>>, vector<8x10xf32>,
    return
  }
  func.func @transform_0(%arg0: i32) -> (i32, i32, i32) {
    %c0_i32 = arith.constant 0 : i32
    %c0_i32_0 = arith.constant 0 : i32
    %c0_i32_1 = arith.constant 0 : i32
    %c0_i32_2 = arith.constant 0 : i32
    return %c0_i32, %c0_i32_0, %c0_i32_1 : i32, i32, i32
  }
  func.func @transform_1(%arg0: i32) -> (i32, i32, i32) {
    %c0_i32 = arith.constant 0 : i32
    %c0_i32_0 = arith.constant 0 : i32
    %c0_i32_1 = arith.constant 0 : i32
    %c0_i32_2 = arith.constant 0 : i32
    return %c0_i32, %c0_i32_0, %c0_i32_1 : i32, i32, i32
  }
  func.func @transform_2(%arg0: i32) -> (i32, i32) {
    %c0_i32 = arith.constant 0 : i32
    %c0_i32_0 = arith.constant 0 : i32
    %c0_i32_1 = arith.constant 0 : i32
    return %c0_i32, %c0_i32_0 : i32, i32
  }
  func.func @transform_3(%arg0: i32) -> (i32, i32) {
    %c0_i32 = arith.constant 0 : i32
    %c0_i32_0 = arith.constant 0 : i32
    %c0_i32_1 = arith.constant 0 : i32
    return %c0_i32, %c0_i32_0 : i32, i32
  }
  func.func @transform_4(%arg0: i32) -> (i32, i32) {
    %c0_i32 = arith.constant 0 : i32
    %c0_i32_0 = arith.constant 0 : i32
    %c0_i32_1 = arith.constant 0 : i32
    return %c0_i32, %c0_i32_0 : i32, i32
  }
}

</mosaic_0001>

<bundles_post_ra>
// kernel: resnet3d_vtp_forward.9
= control target key start
LH: loop header
LB: loop body
LE: loop exit
PB: predicated region body
PF: predicated region fallthrough
CT: control target
= control target key end

     0   :  { %vm155_vm0 = vcmask 1040384   ;;  %v369_v2 = vmov 0   ;;  %vm151_vm1 = vcmask 662528   ;;  %vm252_vm2 = vcmask 1043456   ;;  %s538_s1 = inlined_call_operand.vmem [shape: bf16[81,512], index: 1, kind: input, shape index: {}]   ;;  %s539_s2 = inlined_call_operand.vmem [shape: f32[4,1], index: 2, kind: input, shape index: {}]   ;;  %s540_s3 = inlined_call_operand.vmem [shape: f32[4,1], index: 3, kind: input, shape index: {}]   ;;  %s541_s0 = inlined_call_operand.vmem [shape: bf16[4,81], index: 0, kind: input, shape index: {}]   ;;  %s542_s4 = inlined_call_operand.vmem [shape: f32[4,512], index: 4, kind: output, shape index: {}]  }
   0x1   :  { %v39_v0 = vld [vmem:[%s538_s1 + $0xa0] sm:$0x11]  ;;  %v40_v1 = vld [vmem:[%s538_s1 + $0xa8] sm:$0x11]  ;;  %368 = vset.pattern.permute.xlu0 %v369_v2  ;;  %v157_v7 = vsel %vm155_vm0, 65535, %v369_v2 }
   0x2   :  { %v103_v3 = vunpack.c.l.b16 %v39_v0  ;;  %v104_v4 = vunpack.c.h.b16 %v39_v0  ;;  %v105_v5 = vunpack.c.l.b16 %v40_v1  ;;  %v106_v6 = vunpack.c.h.b16 %v40_v1  ;;  %v329_v12 = vld [vmem:[%s538_s1 + $0x80] sm:$0xf]  ;;  %v365_v13 = vld [vmem:[%s538_s1 + $0x8c] sm:$0xf0]  ;;  %v363_v14 = vld [vmem:[%s538_s1 + $0x84] sm:$0xf] }
   0x3   :  { %v331_v15 = vld [vmem:[%s538_s1 + $0x90] sm:$0xf0]  ;;  %v337_v16 = vld [vmem:[%s538_s1 + $0x88] sm:$0xf]  ;;  %v366_v21 = vld [vmem:[%s538_s1 + $0x94] sm:$0xf0]  ;;  %v330_v24 = vor.u32 %v365_v13, %v329_v12 }
   0x4   :  { %v127_v8 = vpack.c.b16 %v103_v3, %v103_v3  ;;  %v128_v9 = vpack.c.b16 %v104_v4, %v104_v4  ;;  %v129_v10 = vpack.c.b16 %v105_v5, %v105_v5  ;;  %v130_v11 = vpack.c.b16 %v106_v6, %v106_v6  ;;  %v364_v22 = vld [vmem:[%s538_s1 + $0x8c] sm:$0xf]  ;;  %v339_v23 = vld [vmem:[%s538_s1 + $0x98] sm:$0xf0]  ;;  %v313_v26 = vld [vmem:[%s538_s1 + $0x60] sm:$0xf] }
   0x5   :  { %v334_v25 = vor.u32 %v363_v14, %v331_v15  ;;  %v361_v27 = vld [vmem:[%s538_s1 + $0x6c] sm:$0xf0]  ;;  %v338_v28 = vor.u32 %v366_v21, %v337_v16  ;;  %v342_v29 = vor.u32 %v364_v22, %v339_v23  ;;  %v359_v30 = vld [vmem:[%s538_s1 + $0x64] sm:$0xf]  ;;  %v315_v31 = vld [vmem:[%s538_s1 + $0x70] sm:$0xf0] }
   0x6   :  { %v159_v17 = vand.u32 %v157_v7, %v127_v8  ;;  %v162_v18 = vand.u32 %v157_v7, %v128_v9  ;;  %v165_v19 = vand.u32 %v157_v7, %v129_v10  ;;  %v168_v20 = vand.u32 %v157_v7, %v130_v11  ;;  %v321_v32 = vld [vmem:[%s538_s1 + $0x68] sm:$0xf]  ;;  %v362_v33 = vld [vmem:[%s538_s1 + $0x74] sm:$0xf0]  ;;  %v360_v34 = vld [vmem:[%s538_s1 + $0x6c] sm:$0xf] }
   0x7   :  { %v323_v35 = vld [vmem:[%s538_s1 + $0x78] sm:$0xf0]  ;;  %v314_v36 = vor.u32 %v361_v27, %v313_v26  ;;  %v318_v37 = vor.u32 %v359_v30, %v315_v31  ;;  %v297_v38 = vld [vmem:[%s538_s1 + $0x40] sm:$0xf]  ;;  %v357_v39 = vld [vmem:[%s538_s1 + $0x4c] sm:$0xf0]  ;;  %v322_v40 = vor.u32 %v362_v33, %v321_v32 }
   0x8   :  { %172 = vmatpush.bf16.msra.mxu0 %v159_v17  ;;  %185 = vmatpush.bf16.msra.mxu1 %v162_v18  ;;  %v326_v41 = vor.u32 %v360_v34, %v323_v35  ;;  %v355_v42 = vld [vmem:[%s538_s1 + $0x44] sm:$0xf]  ;;  %v299_v43 = vld [vmem:[%s538_s1 + $0x50] sm:$0xf0]  ;;  %v305_v44 = vld [vmem:[%s538_s1 + $0x48] sm:$0xf]  ;;  %v298_v49 = vor.u32 %v357_v39, %v297_v38 }
   0x9   :  { %198 = vmatpush.bf16.msra.mxu2 %v165_v19  ;;  %211 = vmatpush.bf16.msra.mxu3 %v168_v20  ;;  %v358_v45 = vld [vmem:[%s538_s1 + $0x54] sm:$0xf0]  ;;  %v356_v46 = vld [vmem:[%s538_s1 + $0x4c] sm:$0xf]  ;;  %v307_v47 = vld [vmem:[%s538_s1 + $0x58] sm:$0xf0]  ;;  %v302_v50 = vor.u32 %v355_v42, %v299_v43 }
   0xa   :  { %v222_v48 = vld [vmem:[%s539_s2] sm:$0xf]  ;;  %v353_v52 = vld [vmem:[%s538_s1 + $0x2c] sm:$0xf0]  ;;  %v306_v53 = vor.u32 %v358_v45, %v305_v44  ;;  %v310_v54 = vor.u32 %v356_v46, %v307_v47  ;;  %v351_v55 = vld [vmem:[%s538_s1 + $0x24] sm:$0xf] }
   0xb   :  { %v281_v51 = vld [vmem:[%s538_s1 + $0x20] sm:$0xf]  ;;  %v283_v56 = vld [vmem:[%s538_s1 + $0x30] sm:$0xf0]  ;;  %v289_v57 = vld [vmem:[%s538_s1 + $0x28] sm:$0xf]  ;;  %225 = vperm.xlu0 %368, %v222_v48  }
   0xc   :  { %173 = vmatpush.bf16.msra.mxu0 %v330_v24  ;;  %186 = vmatpush.bf16.msra.mxu1 %v334_v25  ;;  %v354_v58 = vld [vmem:[%s538_s1 + $0x34] sm:$0xf0]  ;;  %v352_v59 = vld [vmem:[%s538_s1 + $0x2c] sm:$0xf]  ;;  %v291_v60 = vld [vmem:[%s538_s1 + $0x38] sm:$0xf0]  ;;  %v282_v61 = vor.u32 %v353_v52, %v281_v51  ;;  %v286_v62 = vor.u32 %v351_v55, %v283_v56 }
   0xd   :  { %199 = vmatpush.bf16.msra.mxu2 %v338_v28  ;;  %212 = vmatpush.bf16.msra.mxu3 %v342_v29  ;;  %v265_v63 = vld [vmem:[%s538_s1] sm:$0xf]  ;;  %v349_v0 = vld [vmem:[%s538_s1 + $0xc] sm:$0xf0]  ;;  %v290_v1 = vor.u32 %v354_v58, %v289_v57  ;;  %v294_v2 = vor.u32 %v352_v59, %v291_v60  ;;  %v347_v3 = vld [vmem:[%s538_s1 + $0x4] sm:$0xf] }
   0xe   :  { %v267_v4 = vld [vmem:[%s538_s1 + $0x10] sm:$0xf0]  ;;  %v273_v5 = vld [vmem:[%s538_s1 + $0x8] sm:$0xf]  ;;  %v350_v6 = vld [vmem:[%s538_s1 + $0x14] sm:$0xf0]  ;;  %v266_v10 = vor.u32 %v349_v0, %v265_v63 }
   0xf   :  { %v348_v7 = vld [vmem:[%s538_s1 + $0xc] sm:$0xf]  ;;  %v275_v8 = vld [vmem:[%s538_s1 + $0x18] sm:$0xf0]  ;;  %v232_v9 = vld [vmem:[%s540_s3] sm:$0xf]  ;;  %v270_v11 = vor.u32 %v347_v3, %v267_v4  ;;  %v274_v12 = vor.u32 %v350_v6, %v273_v5 }
  0x10   :  { %174 = vmatpush.bf16.msra.mxu0 %v314_v36  ;;  %187 = vmatpush.bf16.msra.mxu1 %v318_v37  ;;  %v278_v13 = vor.u32 %v348_v7, %v275_v8  ;;  %v18_v14 = vld [vmem:[%s541_s0] sm:$0x3] }
  0x11   :  { %200 = vmatpush.bf16.msra.mxu2 %v322_v40  ;;  %213 = vmatpush.bf16.msra.mxu3 %v326_v41 }
  0x13   :  { %235 = vperm.xlu0 %368, %v232_v9  }
  0x14   :  { %175 = vmatpush.bf16.msra.mxu0 %v298_v49  ;;  %188 = vmatpush.bf16.msra.mxu1 %v302_v50 }
  0x15   :  { %201 = vmatpush.bf16.msra.mxu2 %v306_v53  ;;  %214 = vmatpush.bf16.msra.mxu3 %v310_v54 }
  0x18   :  { %176 = vmatpush.bf16.msra.mxu0 %v282_v61  ;;  %189 = vmatpush.bf16.msra.mxu1 %v286_v62 }
  0x19   :  { %202 = vmatpush.bf16.msra.mxu2 %v290_v1  ;;  %215 = vmatpush.bf16.msra.mxu3 %v294_v2 }
  0x1c   :  { %177 = vmatpush.bf16.msra.mxu0 %v266_v10  ;;  %190 = vmatpush.bf16.msra.mxu1 %v270_v11 }
  0x1d   :  { %203 = vmatpush.bf16.msra.mxu2 %v274_v12  ;;  %216 = vmatpush.bf16.msra.mxu3 %v278_v13 }
  0x1f   :  { %343 = vmatmul.msk.bf16.vlgmr.msra.gmra.mxu0 %vm151_vm1, %v18_v14  ;;  %344 = vmatmul.msk.bf16.vlgmr.msra.gmra.mxu1 %vm151_vm1, %v18_v14 }
  0x20   :  { %345 = vmatmul.msk.bf16.vlgmr.msra.gmra.mxu2 %vm151_vm1, %v18_v14  ;;  %346 = vmatmul.msk.bf16.vlgmr.msra.gmra.mxu3 %vm151_vm1, %v18_v14 }
  0x7d   :  { %v226_v15 = vpop.permute.xlu0 %225 }
  0x85   :  { %v236_v20 = vpop.permute.xlu0 %235 }
  0x9c   :  { %v179_v16 = vpop.f32.mrf.mxu0  ;;  %v192_v17 = vpop.f32.mrf.mxu1 }
  0x9d   :  { %v228_v18 = vmul.f32 %v226_v15, %v179_v16  ;;  %v229_v19 = vmul.f32 %v226_v15, %v192_v17 }
  0x9f   :  { %v238_v21 = vadd.f32 %v236_v20, %v228_v18  ;;  %v239_v22 = vadd.f32 %v236_v20, %v229_v19 }
  0xa1   :  { %v243_v23 = vmax.f32 %v239_v22, 0.0  ;;  %v242_v24 = vmax.f32 %v238_v21, 0.0 }
  0xa3   :  { %v250_v25 = vrot.slane %v243_v23, 4  ;;  %v205_v26 = vpop.f32.mrf.mxu2  ;;  %v218_v27 = vpop.f32.mrf.mxu3 }
  0xa4   :  { %v230_v28 = vmul.f32 %v226_v15, %v205_v26  ;;  %v231_v29 = vmul.f32 %v226_v15, %v218_v27  ;;  %v181_v30 = vpop.f32.mrf.mxu0  ;;  %v194_v31 = vpop.f32.mrf.mxu1 }
  0xa5   :  { %v253_v32 = vsel %vm252_vm2, %v242_v24, %v250_v25 }
  0xa6   :  { %257 = vst [vmem:[%s542_s4] sm:$0xff] %v253_v32  ;;  %v240_v33 = vadd.f32 %v236_v20, %v230_v28  ;;  %v241_v34 = vadd.f32 %v236_v20, %v231_v29 }
  0xa8   :  { %v245_v35 = vmax.f32 %v241_v34, 0.0  ;;  %v244_v36 = vmax.f32 %v240_v33, 0.0 }
  0xaa   :  { %v251_v37 = vrot.slane %v245_v35, 4 }
  0xab   :  { %v207_v38 = vpop.f32.mrf.mxu2  ;;  %v220_v39 = vpop.f32.mrf.mxu3 }
  0xac   :  { %v254_v40 = vsel %vm252_vm2, %v244_v36, %v251_v37 }
  0xad   :  { %258 = vst [vmem:[%s542_s4 + $0x8] sm:$0xff] %v254_v40 }

// kernel: resnet3d_vtp_forward.10
= control target key start
LH: loop header
LB: loop body
LE: loop exit
PB: predicated region body
PF: predicated region fallthrough
CT: control target
= control target key end

     0   :  { %vm78_vm0 = vcmask 1045504   ;;  %v153_v2 = vmov 0   ;;  %vm74_vm1 = vcmask 883712   ;;  %s215_s1 = inlined_call_operand.vmem [shape: bf16[108,128], index: 1, kind: input, shape index: {}]   ;;  %s216_s2 = inlined_call_operand.vmem [shape: f32[8,1], index: 2, kind: input, shape index: {}]   ;;  %s217_s3 = inlined_call_operand.vmem [shape: f32[8,1], index: 3, kind: input, shape index: {}]   ;;  %s218_s0 = inlined_call_operand.vmem [shape: bf16[8,108], index: 0, kind: input, shape index: {}]   ;;  %s219_s4 = inlined_call_operand.vmem [shape: f32[8,128], index: 4, kind: output, shape index: {}]  }
   0x1   :  { %v141_v0 = vld [vmem:[%s215_s1 + $0x30] sm:$0xf]  ;;  %v150_v1 = vld [vmem:[%s215_s1 + $0x30] sm:$0x30]  ;;  %152 = vset.pattern.permute.xlu0 %v153_v2  ;;  %v95_v4 = vld [vmem:[%s216_s2] sm:$0xff] }
   0x2   :  { %v142_v3 = vor.u32 %v150_v1, %v141_v0  ;;  %98 = vperm.xlu0 %152, %v95_v4   ;;  %v149_v6 = vld [vmem:[%s215_s1 + $0x28] sm:$0xff]  ;;  %v148_v7 = vld [vmem:[%s215_s1 + $0x20] sm:$0xff]  ;;  %v147_v9 = vld [vmem:[%s215_s1 + $0x18] sm:$0xff] }
   0x3   :  { %v102_v8 = vld [vmem:[%s217_s3] sm:$0xff]  ;;  %v146_v10 = vld [vmem:[%s215_s1 + $0x10] sm:$0xff]  ;;  %v145_v11 = vld [vmem:[%s215_s1 + $0x8] sm:$0xff] }
   0x4   :  { %v80_v5 = vsel %vm78_vm0, %v142_v3, 0  ;;  %v144_v12 = vld [vmem:[%s215_s1] sm:$0xff] }
   0x5   :  { %83 = vmatpush.bf16.msra.mxu0 %v80_v5  ;;  %v18_v13 = vld [vmem:[%s218_s0] sm:$0xf] }
   0x9   :  { %84 = vmatpush.bf16.msra.mxu0 %v149_v6 }
   0xa   :  { %105 = vperm.xlu0 %152, %v102_v8  }
   0xd   :  { %85 = vmatpush.bf16.msra.mxu0 %v148_v7 }
  0x11   :  { %86 = vmatpush.bf16.msra.mxu0 %v147_v9 }
  0x15   :  { %87 = vmatpush.bf16.msra.mxu0 %v146_v10 }
  0x19   :  { %88 = vmatpush.bf16.msra.mxu0 %v145_v11 }
  0x1d   :  { %89 = vmatpush.bf16.msra.mxu0 %v144_v12 }
  0x20   :  { %143 = vmatmul.msk.bf16.vlgmr.msra.gmra.mxu0 %vm74_vm1, %v18_v13 }
  0x74   :  { %v99_v14 = vpop.permute.xlu0 %98 }
  0x7c   :  { %v106_v17 = vpop.permute.xlu0 %105 }
  0x9d   :  { %v91_v15 = vpop.f32.mrf.mxu0 }
  0x9e   :  { %v101_v16 = vmul.f32 %v99_v14, %v91_v15 }
  0xa0   :  { %v108_v18 = vadd.f32 %v106_v17, %v101_v16 }
  0xa2   :  { %v109_v19 = vmax.f32 %v108_v18, 0.0 }
  0xa4   :  { %110 = vst [vmem:[%s219_s4] sm:$0xff] %v109_v19 }
  0xa5   :  { %v93_v20 = vpop.f32.mrf.mxu0 }

// kernel: resnet3d_vtp_forward.11
= control target key start
LH: loop header
LB: loop body
LE: loop exit
PB: predicated region body
PF: predicated region fallthrough
CT: control target
= control target key end

     0   :  { %v255_v2 = vmov 0   ;;  %vm137_vm0 = vcmask 1043456   ;;  %vm133_vm1 = vcmask 719872   ;;  %s335_s1 = inlined_call_operand.vmem [shape: bf16[216,128], index: 1, kind: input, shape index: {}]   ;;  %s336_s2 = inlined_call_operand.vmem [shape: f32[8,1], index: 2, kind: input, shape index: {}]   ;;  %s337_s3 = inlined_call_operand.vmem [shape: f32[8,1], index: 3, kind: input, shape index: {}]   ;;  %s338_s0 = inlined_call_operand.vmem [shape: bf16[8,216], index: 0, kind: input, shape index: {}]   ;;  %s339_s4 = inlined_call_operand.vmem [shape: f32[8,128], index: 4, kind: output, shape index: {}]  }
   0x1   :  { %v247_v0 = vld [vmem:[%s335_s1 + $0x38] sm:$0xff]  ;;  %v45_v1 = vld [vmem:[%s335_s1 + $0x68] sm:$0xf]  ;;  %254 = vset.pattern.permute.xlu0 %v255_v2  ;;  %v246_v4 = vld [vmem:[%s335_s1 + $0x30] sm:$0xff] }
   0x2   :  { %v105_v3 = vunpack.c.l.b16 %v45_v1  ;;  %141 = vmatpush.bf16.msra.mxu0 %v247_v0  ;;  %v167_v7 = vld [vmem:[%s336_s2] sm:$0xff]  ;;  %v245_v9 = vld [vmem:[%s335_s1 + $0x28] sm:$0xff]  ;;  %v251_v10 = vld [vmem:[%s335_s1 + $0x58] sm:$0xff] }
   0x3   :  { %v252_v8 = vld [vmem:[%s335_s1 + $0x60] sm:$0xff]  ;;  %170 = vperm.xlu0 %254, %v167_v7   ;;  %v250_v13 = vld [vmem:[%s335_s1 + $0x50] sm:$0xff]  ;;  %v243_v14 = vld [vmem:[%s335_s1 + $0x18] sm:$0xff] }
   0x4   :  { %v119_v5 = vpack.c.b16 %v105_v3, %v105_v3  ;;  %v244_v11 = vld [vmem:[%s335_s1 + $0x20] sm:$0xff]  ;;  %v249_v15 = vld [vmem:[%s335_s1 + $0x48] sm:$0xff]  ;;  %v242_v16 = vld [vmem:[%s335_s1 + $0x10] sm:$0xff] }
   0x5   :  { %v174_v12 = vld [vmem:[%s337_s3] sm:$0xff]  ;;  %v241_v20 = vld [vmem:[%s335_s1 + $0x8] sm:$0xff] }
   0x6   :  { %v139_v6 = vsel %vm137_vm0, %v119_v5, 0  ;;  %142 = vmatpush.bf16.msra.mxu0 %v246_v4  ;;  %v18_v17 = vld [vmem:[%s338_s0] sm:$0xff] }
   0x7   :  { %156 = vmatpush.bf16.msra.mxu1 %v139_v6  ;;  %v48_v18 = vunpack.c.h.b16 %v18_v17  ;;  %v248_v19 = vld [vmem:[%s335_s1 + $0x40] sm:$0xff]  ;;  %v47_v22 = vunpack.c.l.b16 %v18_v17 }
   0x8   :  { %v240_v23 = vld [vmem:[%s335_s1] sm:$0xff] }
   0x9   :  { %v50_v21 = vpack.c.b16 %v48_v18, %v48_v18  ;;  %v49_v24 = vpack.c.b16 %v47_v22, %v47_v22 }
   0xa   :  { %143 = vmatpush.bf16.msra.mxu0 %v245_v9 }
   0xb   :  { %157 = vmatpush.bf16.msra.mxu1 %v252_v8  ;;  %177 = vperm.xlu0 %254, %v174_v12  }
   0xe   :  { %144 = vmatpush.bf16.msra.mxu0 %v244_v11 }
   0xf   :  { %158 = vmatpush.bf16.msra.mxu1 %v251_v10 }
  0x12   :  { %145 = vmatpush.bf16.msra.mxu0 %v243_v14 }
  0x13   :  { %159 = vmatpush.bf16.msra.mxu1 %v250_v13 }
  0x16   :  { %146 = vmatpush.bf16.msra.mxu0 %v242_v16 }
  0x17   :  { %160 = vmatpush.bf16.msra.mxu1 %v249_v15 }
  0x1a   :  { %147 = vmatpush.bf16.msra.mxu0 %v241_v20 }
  0x1b   :  { %161 = vmatpush.bf16.msra.mxu1 %v248_v19 }
  0x1e   :  { %239 = vmatmul.msk.bf16.vlgmr.msra.gmra.mxu1 %vm133_vm1, %v50_v21  ;;  %148 = vmatpush.bf16.msra.mxu0 %v240_v23 }
  0x21   :  { %149 = vmatmul.bf16.vlgmr.msra.gmra.mxu0 %v49_v24 }
  0x75   :  { %v171_v25 = vpop.permute.xlu0 %170 }
  0x7d   :  { %v178_v30 = vpop.permute.xlu0 %177 }
  0x9b   :  { %v163_v26 = vpop.f32.mrf.mxu1 }
  0x9e   :  { %v150_v27 = vpop.f32.mrf.mxu0 }
  0x9f   :  { %v164_v28 = vadd.f32 %v163_v26, %v150_v27 }
  0xa1   :  { %v173_v29 = vmul.f32 %v171_v25, %v164_v28 }
  0xa3   :  { %v165_v31 = vpop.f32.mrf.mxu1  ;;  %v180_v32 = vadd.f32 %v178_v30, %v173_v29 }
  0xa5   :  { %v181_v33 = vmax.f32 %v180_v32, 0.0 }
  0xa6   :  { %v152_v34 = vpop.f32.mrf.mxu0 }
  0xa7   :  { %182 = vst [vmem:[%s339_s4] sm:$0xff] %v181_v33 }

// kernel: resnet3d_vtp_forward.12
= control target key start
LH: loop header
LB: loop body
LE: loop exit
PB: predicated region body
PF: predicated region fallthrough
CT: control target
= control target key end

     0   :  { %vm27_vm0 = vcmask 1041408   ;;  %v68_v0 = vmov 0   ;;  %vm23_vm1 = vcmask 31744   ;;  %s117_s1 = inlined_call_operand.vmem [shape: bf16[4,128], index: 1, kind: input, shape index: {}]   ;;  %s118_s2 = inlined_call_operand.vmem [shape: f32[8,1], index: 2, kind: input, shape index: {}]   ;;  %s119_s0 = inlined_call_operand.vmem [shape: bf16[8,4], index: 0, kind: input, shape index: {}]   ;;  %s120_s3 = inlined_call_operand.vmem [shape: f32[8,1], index: 3, kind: input, shape index: {}]   ;;  %s121_s4 = inlined_call_operand.vmem [shape: f32[8,128], index: 4, kind: input, shape index: {}]   ;;  %s122_s5 = inlined_call_operand.vmem [shape: f32[8,128], index: 5, kind: output, shape index: {}]  }
   0x1   :  { %67 = vset.pattern.permute.xlu0 %v68_v0  ;;  %v22_v1 = vld [vmem:[%s117_s1] sm:$0x3] }
   0x2   :  { %v44_v2 = vld [vmem:[%s118_s2] sm:$0xff]  ;;  %v29_v3 = vsel %vm27_vm0, %v22_v1, 0 }
   0x3   :  { %47 = vperm.xlu0 %67, %v44_v2   ;;  %38 = vmatpush.bf16.msra.mxu0 %v29_v3  ;;  %v21_v4 = vld [vmem:[%s119_s0] sm:$0xf] }
   0x4   :  { %v51_v5 = vld [vmem:[%s120_s3] sm:$0xff] }
   0x5   :  { %v58_v10 = vld [vmem:[%s121_s4] sm:$0xff] }
   0x6   :  { %65 = vmatmul.msk.bf16.vlgmr.msra.gmra.mxu0 %vm23_vm1, %v21_v4 }
   0xb   :  { %54 = vperm.xlu0 %67, %v51_v5  }
  0x75   :  { %v48_v6 = vpop.permute.xlu0 %47 }
  0x7d   :  { %v55_v9 = vpop.permute.xlu0 %54 }
  0x83   :  { %v40_v7 = vpop.f32.mrf.mxu0 }
  0x84   :  { %v50_v8 = vmul.f32 %v48_v6, %v40_v7 }
  0x86   :  { %v57_v11 = vadd.f32 %v55_v9, %v50_v8 }
  0x88   :  { %v59_v12 = vadd.f32 %v58_v10, %v57_v11 }
  0x8a   :  { %60 = vst [vmem:[%s122_s5] sm:$0xff] %v59_v12 }
  0x8b   :  { %v42_v13 = vpop.f32.mrf.mxu0 }

// kernel: resnet3d_vtp_forward.13
= control target key start
LH: loop header
LB: loop body
LE: loop exit
PB: predicated region body
PF: predicated region fallthrough
CT: control target
= control target key end

     0   :  { %vm141_vm0 = vcmask 1043456   ;;  %v289_v4 = vmov 0   ;;  %vm137_vm1 = vcmask 719872   ;;  %vm203_vm2 = vcmask 261120   ;;  %s387_s1 = inlined_call_operand.vmem [shape: bf16[216,32], index: 1, kind: input, shape index: {}]   ;;  %s388_s2 = inlined_call_operand.vmem [shape: f32[16,1], index: 2, kind: input, shape index: {}]   ;;  %s389_s3 = inlined_call_operand.vmem [shape: f32[16,1], index: 3, kind: input, shape index: {}]   ;;  %s390_s0 = inlined_call_operand.vmem [shape: bf16[16,216], index: 0, kind: input, shape index: {}]   ;;  %s391_s4 = inlined_call_operand.vmem [shape: f32[16,32], index: 4, kind: output, shape index: {}]  }
   0x1   :  { %v280_v0 = vld [vmem:[%s387_s1 + $0x38] sm:$0xff]  ;;  %v46_v1 = vld [vmem:[%s387_s1 + $0x68] sm:$0xf]  ;;  %v279_v3 = vld [vmem:[%s387_s1 + $0x30] sm:$0xff]  ;;  %287 = vset.pattern.permute.xlu0 %v289_v4  ;;  %288 = vset.pattern.permute.xlu1 %v289_v4 }
   0x2   :  { %v109_v2 = vunpack.c.l.b16 %v46_v1  ;;  %145 = vmatpush.bf16.msra.mxu0 %v280_v0  ;;  %v285_v7 = vld [vmem:[%s387_s1 + $0x60] sm:$0xff]  ;;  %v278_v8 = vld [vmem:[%s387_s1 + $0x28] sm:$0xff]  ;;  %v284_v11 = vld [vmem:[%s387_s1 + $0x58] sm:$0xff] }
   0x3   :  { %v173_v9 = vld [vmem:[%s388_s2] sm:$0xff]  ;;  %v174_v13 = vld [vmem:[%s388_s2 + $0x8] sm:$0xff]  ;;  %v283_v15 = vld [vmem:[%s387_s1 + $0x50] sm:$0xff] }
   0x4   :  { %v123_v5 = vpack.c.b16 %v109_v2, %v109_v2  ;;  %v187_v10 = vld [vmem:[%s389_s3] sm:$0xff]  ;;  %177 = vperm.xlu0 %287, %v173_v9   ;;  %v188_v14 = vld [vmem:[%s389_s3 + $0x8] sm:$0xff]  ;;  %v276_v16 = vld [vmem:[%s387_s1 + $0x18] sm:$0xff] }
   0x5   :  { %191 = vperm.xlu1 %288, %v187_v10   ;;  %v277_v12 = vld [vmem:[%s387_s1 + $0x20] sm:$0xff]  ;;  %v282_v17 = vld [vmem:[%s387_s1 + $0x48] sm:$0xff]  ;;  %v275_v18 = vld [vmem:[%s387_s1 + $0x10] sm:$0xff] }
   0x6   :  { %v143_v6 = vsel %vm141_vm0, %v123_v5, 0  ;;  %146 = vmatpush.bf16.msra.mxu0 %v279_v3  ;;  %v281_v19 = vld [vmem:[%s387_s1 + $0x40] sm:$0xff]  ;;  %v274_v20 = vld [vmem:[%s387_s1 + $0x8] sm:$0xff] }
   0x7   :  { %161 = vmatpush.bf16.msra.mxu1 %v143_v6  ;;  %v271_v21 = vld [vmem:[%s390_s0 + $0x4] sm:$0xf]  ;;  %v214_v22 = vld [vmem:[%s390_s0 + $0x8] sm:$0xf0]  ;;  %v212_v25 = vld [vmem:[%s390_s0] sm:$0xf] }
   0x8   :  { %v217_v23 = vor.u32 %v271_v21, %v214_v22  ;;  %v273_v24 = vld [vmem:[%s387_s1] sm:$0xff]  ;;  %v272_v26 = vld [vmem:[%s390_s0 + $0x4] sm:$0xf0] }
   0x9   :  { %v213_v27 = vor.u32 %v272_v26, %v212_v25 }
   0xa   :  { %147 = vmatpush.bf16.msra.mxu0 %v278_v8 }
   0xb   :  { %162 = vmatpush.bf16.msra.mxu1 %v285_v7 }
   0xc   :  { %182 = vperm.xlu0 %287, %v174_v13  }
   0xd   :  { %196 = vperm.xlu1 %288, %v188_v14  }
   0xe   :  { %148 = vmatpush.bf16.msra.mxu0 %v277_v12 }
   0xf   :  { %163 = vmatpush.bf16.msra.mxu1 %v284_v11 }
  0x12   :  { %149 = vmatpush.bf16.msra.mxu0 %v276_v16 }
  0x13   :  { %164 = vmatpush.bf16.msra.mxu1 %v283_v15 }
  0x16   :  { %150 = vmatpush.bf16.msra.mxu0 %v275_v18 }
  0x17   :  { %165 = vmatpush.bf16.msra.mxu1 %v282_v17 }
  0x1a   :  { %151 = vmatpush.bf16.msra.mxu0 %v274_v20 }
  0x1b   :  { %166 = vmatpush.bf16.msra.mxu1 %v281_v19 }
  0x1e   :  { %270 = vmatmul.msk.bf16.vlgmr.msra.gmra.mxu1 %vm137_vm1, %v217_v23  ;;  %152 = vmatpush.bf16.msra.mxu0 %v273_v24 }
  0x21   :  { %153 = vmatmul.bf16.vlgmr.msra.gmra.mxu0 %v213_v27 }
  0x76   :  { %v178_v29 = vpop.permute.xlu0 %177 }
  0x77   :  { %v192_v32 = vpop.permute.xlu1 %191 }
  0x7e   :  { %v183_v39 = vpop.permute.xlu0 %182 }
  0x7f   :  { %v197_v41 = vpop.permute.xlu1 %196 }
  0x9b   :  { %v168_v28 = vpop.f32.mrf.mxu1 }
  0x9e   :  { %v154_v30 = vpop.f32.mrf.mxu0 }
  0x9f   :  { %v169_v31 = vadd.f32 %v168_v28, %v154_v30 }
  0xa1   :  { %v185_v33 = vmul.f32 %v178_v29, %v169_v31 }
  0xa3   :  { %v199_v34 = vadd.f32 %v192_v32, %v185_v33  ;;  %v170_v36 = vpop.f32.mrf.mxu1 }
  0xa5   :  { %v201_v35 = vmax.f32 %v199_v34, 0.0 }
  0xa6   :  { %v156_v37 = vpop.f32.mrf.mxu0 }
  0xa7   :  { %204 = vst.msk [vmem:[%s391_s4] sm:$0xff] %vm203_vm2, %v201_v35  ;;  %v171_v38 = vadd.f32 %v170_v36, %v156_v37 }
  0xa9   :  { %v186_v40 = vmul.f32 %v183_v39, %v171_v38 }
  0xab   :  { %v200_v42 = vadd.f32 %v197_v41, %v186_v40 }
  0xad   :  { %v202_v43 = vmax.f32 %v200_v42, 0.0 }
  0xaf   :  { %205 = vst.msk [vmem:[%s391_s4 + $0x8] sm:$0xff] %vm203_vm2, %v202_v43 }

// kernel: resnet3d_vtp_forward.14
= control target key start
LH: loop header
LB: loop body
LE: loop exit
PB: predicated region body
PF: predicated region fallthrough
CT: control target
= control target key end

     0   :  { %v513_v6 = vmov 0   ;;  %vm257_vm0 = vcmask 392192   ;;  %vm347_vm1 = vcmask 261120   ;;  %s662_s1 = inlined_call_operand.vmem [shape: bf16[432,32], index: 1, kind: input, shape index: {}]   ;;  %s663_s2 = inlined_call_operand.vmem [shape: f32[16,1], index: 2, kind: input, shape index: {}]   ;;  %s664_s0 = inlined_call_operand.vmem [shape: bf16[16,432], index: 0, kind: input, shape index: {}]   ;;  %s665_s3 = inlined_call_operand.vmem [shape: f32[16,1], index: 3, kind: input, shape index: {}]   ;;  %s666_s4 = inlined_call_operand.vmem [shape: f32[16,32], index: 4, kind: output, shape index: {}]  }
   0x1   :  { %v490_v0 = vld [vmem:[%s662_s1 + $0x38] sm:$0xff]  ;;  %v489_v3 = vld [vmem:[%s662_s1 + $0x30] sm:$0xff]  ;;  %511 = vset.pattern.permute.xlu0 %v513_v6  ;;  %512 = vset.pattern.permute.xlu1 %v513_v6  ;;  %v488_v8 = vld [vmem:[%s662_s1 + $0x28] sm:$0xff] }
   0x2   :  { %v498_v1 = vld [vmem:[%s662_s1 + $0x78] sm:$0xff]  ;;  %261 = vmatpush.bf16.msra.mxu0 %v490_v0  ;;  %v497_v4 = vld [vmem:[%s662_s1 + $0x70] sm:$0xff]  ;;  %v496_v9 = vld [vmem:[%s662_s1 + $0x68] sm:$0xff] }
   0x3   :  { %v506_v2 = vld [vmem:[%s662_s1 + $0xb8] sm:$0xff]  ;;  %275 = vmatpush.bf16.msra.mxu1 %v498_v1  ;;  %v505_v5 = vld [vmem:[%s662_s1 + $0xb0] sm:$0xff]  ;;  %v504_v10 = vld [vmem:[%s662_s1 + $0xa8] sm:$0xff] }
   0x4   :  { %289 = vmatpush.bf16.msra.mxu2 %v506_v2  ;;  %v509_v7 = vld [vmem:[%s662_s1 + $0xd0] sm:$0xff]  ;;  %v508_v11 = vld [vmem:[%s662_s1 + $0xc8] sm:$0xff]  ;;  %v487_v12 = vld [vmem:[%s662_s1 + $0x20] sm:$0xff] }
   0x5   :  { %308 = vmatpush.bf16.msra.mxu3 %v509_v7  ;;  %v495_v13 = vld [vmem:[%s662_s1 + $0x60] sm:$0xff]  ;;  %v480_v17 = vld [vmem:[%s664_s0 + $0xc] sm:$0xf]  ;;  %v366_v18 = vld [vmem:[%s664_s0 + $0x18] sm:$0xf0] }
   0x6   :  { %262 = vmatpush.bf16.msra.mxu0 %v489_v3  ;;  %v503_v14 = vld [vmem:[%s662_s1 + $0xa0] sm:$0xff]  ;;  %v486_v20 = vld [vmem:[%s662_s1 + $0x18] sm:$0xff]  ;;  %v369_v23 = vor.u32 %v480_v17, %v366_v18  ;;  %v318_v24 = vld [vmem:[%s663_s2 + $0x8] sm:$0xff] }
   0x7   :  { %276 = vmatpush.bf16.msra.mxu1 %v497_v4  ;;  %v507_v15 = vld [vmem:[%s662_s1 + $0xc0] sm:$0xff]  ;;  %v494_v21 = vld [vmem:[%s662_s1 + $0x58] sm:$0xff]  ;;  %v485_v25 = vld [vmem:[%s662_s1 + $0x10] sm:$0xff] }
   0x8   :  { %290 = vmatpush.bf16.msra.mxu2 %v505_v5  ;;  %v317_v16 = vld [vmem:[%s663_s2] sm:$0xff]  ;;  %v502_v22 = vld [vmem:[%s662_s1 + $0x98] sm:$0xff]  ;;  %v493_v26 = vld [vmem:[%s662_s1 + $0x50] sm:$0xff] }
   0x9   :  { %309 = vmatpush.bf16.msra.mxu3 %v508_v11  ;;  %321 = vperm.xlu0 %511, %v317_v16   ;;  %v331_v19 = vld [vmem:[%s665_s3] sm:$0xff]  ;;  %v332_v27 = vld [vmem:[%s665_s3 + $0x8] sm:$0xff]  ;;  %v501_v28 = vld [vmem:[%s662_s1 + $0x90] sm:$0xff] }
   0xa   :  { %263 = vmatpush.bf16.msra.mxu0 %v488_v8  ;;  %335 = vperm.xlu1 %512, %v331_v19   ;;  %v484_v29 = vld [vmem:[%s662_s1 + $0x8] sm:$0xff]  ;;  %v483_v32 = vld [vmem:[%s662_s1] sm:$0xff]  ;;  %v481_v35 = vld [vmem:[%s664_s0 + $0xc] sm:$0xf0] }
   0xb   :  { %277 = vmatpush.bf16.msra.mxu1 %v496_v9  ;;  %v492_v30 = vld [vmem:[%s662_s1 + $0x48] sm:$0xff]  ;;  %v491_v33 = vld [vmem:[%s662_s1 + $0x40] sm:$0xff]  ;;  %v358_v37 = vld [vmem:[%s664_s0 + $0x10] sm:$0xf0] }
   0xc   :  { %291 = vmatpush.bf16.msra.mxu2 %v504_v10  ;;  %v500_v31 = vld [vmem:[%s662_s1 + $0x88] sm:$0xff]  ;;  %v356_v34 = vld [vmem:[%s664_s0] sm:$0xf]  ;;  %v479_v36 = vld [vmem:[%s664_s0 + $0x4] sm:$0xf] }
   0xd   :  { %310 = vmatpush.bf16.msra.mxu3 %v507_v15  ;;  %v499_v38 = vld [vmem:[%s662_s1 + $0x80] sm:$0xff]  ;;  %v364_v39 = vld [vmem:[%s664_s0 + $0x8] sm:$0xf]  ;;  %v482_v40 = vld [vmem:[%s664_s0 + $0x14] sm:$0xf0]  ;;  %v357_v41 = vor.u32 %v481_v35, %v356_v34  ;;  %v361_v42 = vor.u32 %v479_v36, %v358_v37 }
   0xe   :  { %264 = vmatpush.bf16.msra.mxu0 %v487_v12  ;;  %v365_v43 = vor.u32 %v482_v40, %v364_v39 }
   0xf   :  { %278 = vmatpush.bf16.msra.mxu1 %v495_v13 }
  0x10   :  { %292 = vmatpush.bf16.msra.mxu2 %v503_v14  ;;  %478 = vmatmul.msk.bf16.vlgmr.msra.gmra.mxu3 %vm257_vm0, %v369_v23 }
  0x11   :  { %326 = vperm.xlu0 %511, %v318_v24  }
  0x12   :  { %265 = vmatpush.bf16.msra.mxu0 %v486_v20  ;;  %340 = vperm.xlu1 %512, %v332_v27  }
  0x13   :  { %279 = vmatpush.bf16.msra.mxu1 %v494_v21 }
  0x14   :  { %293 = vmatpush.bf16.msra.mxu2 %v502_v22 }
  0x16   :  { %266 = vmatpush.bf16.msra.mxu0 %v485_v25 }
  0x17   :  { %280 = vmatpush.bf16.msra.mxu1 %v493_v26 }
  0x18   :  { %294 = vmatpush.bf16.msra.mxu2 %v501_v28 }
  0x1a   :  { %267 = vmatpush.bf16.msra.mxu0 %v484_v29 }
  0x1b   :  { %281 = vmatpush.bf16.msra.mxu1 %v492_v30 }
  0x1c   :  { %295 = vmatpush.bf16.msra.mxu2 %v500_v31 }
  0x1e   :  { %268 = vmatpush.bf16.msra.mxu0 %v483_v32 }
  0x1f   :  { %282 = vmatpush.bf16.msra.mxu1 %v491_v33 }
  0x20   :  { %296 = vmatpush.bf16.msra.mxu2 %v499_v38 }
  0x21   :  { %269 = vmatmul.bf16.vlgmr.msra.gmra.mxu0 %v357_v41 }
  0x22   :  { %283 = vmatmul.bf16.vlgmr.msra.gmra.mxu1 %v361_v42 }
  0x23   :  { %297 = vmatmul.bf16.vlgmr.msra.gmra.mxu2 %v365_v43 }
  0x7b   :  { %v322_v50 = vpop.permute.xlu0 %321 }
  0x7c   :  { %v336_v51 = vpop.permute.xlu1 %335 }
  0x83   :  { %v327_v63 = vpop.permute.xlu0 %326 }
  0x84   :  { %v341_v1 = vpop.permute.xlu1 %340 }
  0x93   :  { %v312_v47 = vpop.f32.mrf.mxu3 }
  0x9b   :  { %v314_v61 = vpop.f32.mrf.mxu3 }
  0x9e   :  { %v270_v44 = vpop.f32.mrf.mxu0 }
  0x9f   :  { %v284_v45 = vpop.f32.mrf.mxu1 }
  0xa0   :  { %v285_v46 = vadd.f32 %v284_v45, %v270_v44 }
  0xa6   :  { %v298_v48 = vpop.f32.mrf.mxu2  ;;  %v272_v53 = vpop.f32.mrf.mxu0 }
  0xa7   :  { %v299_v49 = vadd.f32 %v298_v48, %v285_v46  ;;  %v286_v54 = vpop.f32.mrf.mxu1 }
  0xa8   :  { %v287_v57 = vadd.f32 %v286_v54, %v272_v53 }
  0xa9   :  { %v313_v52 = vadd.f32 %v312_v47, %v299_v49 }
  0xab   :  { %v329_v55 = vmul.f32 %v322_v50, %v313_v52 }
  0xad   :  { %v343_v56 = vadd.f32 %v336_v51, %v329_v55 }
  0xae   :  { %v300_v58 = vpop.f32.mrf.mxu2 }
  0xaf   :  { %v345_v59 = vmax.f32 %v343_v56, 0.0  ;;  %v301_v60 = vadd.f32 %v300_v58, %v287_v57 }
  0xb1   :  { %348 = vst.msk [vmem:[%s666_s4] sm:$0xff] %vm347_vm1, %v345_v59  ;;  %v315_v62 = vadd.f32 %v314_v61, %v301_v60 }
  0xb3   :  { %v330_v0 = vmul.f32 %v327_v63, %v315_v62 }
  0xb5   :  { %v344_v2 = vadd.f32 %v341_v1, %v330_v0 }
  0xb7   :  { %v346_v3 = vmax.f32 %v344_v2, 0.0 }
  0xb9   :  { %349 = vst.msk [vmem:[%s666_s4 + $0x8] sm:$0xff] %vm347_vm1, %v346_v3 }

// kernel: resnet3d_vtp_forward.15
= control target key start
LH: loop header
LB: loop body
LE: loop exit
PB: predicated region body
PF: predicated region fallthrough
CT: control target
= control target key end

     0   :  { %vm33_vm0 = vcmask 1043456   ;;  %v99_v1 = vmov 0   ;;  %vm29_vm1 = vcmask 64512   ;;  %vm83_vm2 = vcmask 261120   ;;  %s160_s1 = inlined_call_operand.vmem [shape: bf16[8,32], index: 1, kind: input, shape index: {}]   ;;  %s161_s0 = inlined_call_operand.vmem [shape: bf16[16,8], index: 0, kind: input, shape index: {}]   ;;  %s162_s2 = inlined_call_operand.vmem [shape: f32[16,1], index: 2, kind: input, shape index: {}]   ;;  %s163_s3 = inlined_call_operand.vmem [shape: f32[16,1], index: 3, kind: input, shape index: {}]   ;;  %s164_s4 = inlined_call_operand.vmem [shape: f32[16,32], index: 4, kind: input, shape index: {}]   ;;  %s165_s5 = inlined_call_operand.vmem [shape: f32[16,32], index: 5, kind: output, shape index: {}]  }
   0x1   :  { %v23_v0 = vld [vmem:[%s160_s1] sm:$0xf]  ;;  %97 = vset.pattern.permute.xlu0 %v99_v1  ;;  %98 = vset.pattern.permute.xlu1 %v99_v1  ;;  %v52_v6 = vld [vmem:[%s162_s2 + $0x8] sm:$0xff] }
   0x2   :  { %v51_v2 = vld [vmem:[%s162_s2] sm:$0xff]  ;;  %v35_v3 = vsel %vm33_vm0, %v23_v0, 0  ;;  %v66_v7 = vld [vmem:[%s163_s3 + $0x8] sm:$0xff] }
   0x3   :  { %v95_v4 = vld [vmem:[%s161_s0] sm:$0xff]  ;;  %55 = vperm.xlu0 %97, %v51_v2   ;;  %44 = vmatpush.bf16.msra.mxu0 %v35_v3  ;;  %v80_v19 = vld [vmem:[%s164_s4 + $0x8] sm:$0xff] }
   0x4   :  { %v65_v5 = vld [vmem:[%s163_s3] sm:$0xff] }
   0x5   :  { %69 = vperm.xlu1 %98, %v65_v5   ;;  %v79_v12 = vld [vmem:[%s164_s4] sm:$0xff] }
   0x6   :  { %94 = vmatmul.msk.bf16.vlgmr.msra.gmra.mxu0 %vm29_vm1, %v95_v4 }
   0xb   :  { %60 = vperm.xlu0 %97, %v52_v6  }
   0xd   :  { %74 = vperm.xlu1 %98, %v66_v7  }
  0x75   :  { %v56_v8 = vpop.permute.xlu0 %55 }
  0x77   :  { %v70_v9 = vpop.permute.xlu1 %69 }
  0x7d   :  { %v61_v15 = vpop.permute.xlu0 %60 }
  0x7f   :  { %v75_v18 = vpop.permute.xlu1 %74 }
  0x83   :  { %v46_v10 = vpop.f32.mrf.mxu0 }
  0x84   :  { %v63_v11 = vmul.f32 %v56_v8, %v46_v10 }
  0x86   :  { %v77_v13 = vadd.f32 %v70_v9, %v63_v11 }
  0x88   :  { %v81_v14 = vadd.f32 %v79_v12, %v77_v13 }
  0x8a   :  { %84 = vst.msk [vmem:[%s165_s5] sm:$0xff] %vm83_vm2, %v81_v14 }
  0x8b   :  { %v48_v16 = vpop.f32.mrf.mxu0 }
  0x8c   :  { %v64_v17 = vmul.f32 %v61_v15, %v48_v16 }
  0x8e   :  { %v78_v20 = vadd.f32 %v75_v18, %v64_v17 }
  0x90   :  { %v82_v21 = vadd.f32 %v80_v19, %v78_v20 }
  0x92   :  { %85 = vst.msk [vmem:[%s165_s5 + $0x8] sm:$0xff] %vm83_vm2, %v82_v21 }

// kernel: resnet3d_vtp_forward.16
= control target key start
LH: loop header
LB: loop body
LE: loop exit
PB: predicated region body
PF: predicated region fallthrough
CT: control target
= control target key end

     0   :  { %v613_v7 = vmov 0   ;;  %vm280_vm0 = vcmask 392192   ;;  %vm423_vm1 = vcmask 261120   ;;  %s810_s1 = inlined_call_operand.vmem [shape: bf16[432,32], index: 1, kind: input, shape index: {}]   ;;  %s811_s0 = inlined_call_operand.vmem [shape: bf16[32,432], index: 0, kind: input, shape index: {}]   ;;  %s812_s2 = inlined_call_operand.vmem [shape: f32[32,1], index: 2, kind: input, shape index: {}]   ;;  %s813_s3 = inlined_call_operand.vmem [shape: f32[32,1], index: 3, kind: input, shape index: {}]   ;;  %s814_s4 = inlined_call_operand.vmem [shape: f32[32,32], index: 4, kind: output, shape index: {}]  }
   0x1   :  { %v589_v0 = vld [vmem:[%s810_s1 + $0x38] sm:$0xff]  ;;  %v588_v3 = vld [vmem:[%s810_s1 + $0x30] sm:$0xff]  ;;  %611 = vset.pattern.permute.xlu1 %v613_v7  ;;  %610 = vset.pattern.permute.xlu0 %v613_v7  ;;  %v587_v8 = vld [vmem:[%s810_s1 + $0x28] sm:$0xff] }
   0x2   :  { %v597_v1 = vld [vmem:[%s810_s1 + $0x78] sm:$0xff]  ;;  %287 = vmatpush.bf16.msra.mxu0 %v589_v0  ;;  %v596_v4 = vld [vmem:[%s810_s1 + $0x70] sm:$0xff]  ;;  %612 = vset.pattern.permute.xlu2 %v613_v7  ;;  %v595_v9 = vld [vmem:[%s810_s1 + $0x68] sm:$0xff] }
   0x3   :  { %v605_v2 = vld [vmem:[%s810_s1 + $0xb8] sm:$0xff]  ;;  %306 = vmatpush.bf16.msra.mxu1 %v597_v1  ;;  %v604_v5 = vld [vmem:[%s810_s1 + $0xb0] sm:$0xff]  ;;  %v603_v10 = vld [vmem:[%s810_s1 + $0xa8] sm:$0xff] }
   0x4   :  { %325 = vmatpush.bf16.msra.mxu2 %v605_v2  ;;  %v608_v6 = vld [vmem:[%s810_s1 + $0xd0] sm:$0xff]  ;;  %v607_v11 = vld [vmem:[%s810_s1 + $0xc8] sm:$0xff]  ;;  %v586_v12 = vld [vmem:[%s810_s1 + $0x20] sm:$0xff] }
   0x5   :  { %349 = vmatpush.bf16.msra.mxu3 %v608_v6  ;;  %v594_v13 = vld [vmem:[%s810_s1 + $0x60] sm:$0xff]  ;;  %v575_v16 = vld [vmem:[%s811_s0 + $0xc] sm:$0xf]  ;;  %v444_v17 = vld [vmem:[%s811_s0 + $0x18] sm:$0xf0] }
   0x6   :  { %288 = vmatpush.bf16.msra.mxu0 %v588_v3  ;;  %v602_v14 = vld [vmem:[%s810_s1 + $0xa0] sm:$0xff]  ;;  %v365_v18 = vld [vmem:[%s812_s2 + $0x10] sm:$0xff]  ;;  %v585_v20 = vld [vmem:[%s810_s1 + $0x18] sm:$0xff]  ;;  %v447_v23 = vor.u32 %v575_v16, %v444_v17 }
   0x7   :  { %307 = vmatpush.bf16.msra.mxu1 %v596_v4  ;;  %v606_v15 = vld [vmem:[%s810_s1 + $0xc0] sm:$0xff]  ;;  %379 = vperm.xlu1 %611, %v365_v18   ;;  %v593_v21 = vld [vmem:[%s810_s1 + $0x58] sm:$0xff]  ;;  %v584_v24 = vld [vmem:[%s810_s1 + $0x10] sm:$0xff] }
   0x8   :  { %326 = vmatpush.bf16.msra.mxu2 %v604_v5  ;;  %v363_v19 = vld [vmem:[%s812_s2] sm:$0xff]  ;;  %v601_v22 = vld [vmem:[%s810_s1 + $0x98] sm:$0xff]  ;;  %v592_v25 = vld [vmem:[%s810_s1 + $0x50] sm:$0xff] }
   0x9   :  { %350 = vmatpush.bf16.msra.mxu3 %v607_v11  ;;  %369 = vperm.xlu0 %610, %v363_v19   ;;  %v366_v26 = vld [vmem:[%s812_s2 + $0x18] sm:$0xff]  ;;  %v364_v27 = vld [vmem:[%s812_s2 + $0x8] sm:$0xff]  ;;  %v600_v28 = vld [vmem:[%s810_s1 + $0x90] sm:$0xff] }
   0xa   :  { %289 = vmatpush.bf16.msra.mxu0 %v587_v8  ;;  %v391_v29 = vld [vmem:[%s813_s3] sm:$0xff]  ;;  %v583_v30 = vld [vmem:[%s810_s1 + $0x8] sm:$0xff]  ;;  %v576_v36 = vld [vmem:[%s811_s0 + $0xc] sm:$0xf0] }
   0xb   :  { %308 = vmatpush.bf16.msra.mxu1 %v595_v9  ;;  %397 = vperm.xlu2 %612, %v391_v29   ;;  %v591_v31 = vld [vmem:[%s810_s1 + $0x48] sm:$0xff]  ;;  %v582_v33 = vld [vmem:[%s810_s1] sm:$0xff]  ;;  %v436_v39 = vld [vmem:[%s811_s0 + $0x10] sm:$0xf0] }
   0xc   :  { %327 = vmatpush.bf16.msra.mxu2 %v603_v10  ;;  %v599_v32 = vld [vmem:[%s810_s1 + $0x88] sm:$0xff]  ;;  %v590_v34 = vld [vmem:[%s810_s1 + $0x40] sm:$0xff]  ;;  %v394_v40 = vld [vmem:[%s813_s3 + $0x18] sm:$0xff] }
   0xd   :  { %351 = vmatpush.bf16.msra.mxu3 %v606_v15  ;;  %v434_v35 = vld [vmem:[%s811_s0] sm:$0xf]  ;;  %v574_v37 = vld [vmem:[%s811_s0 + $0x4] sm:$0xf]  ;;  %v392_v38 = vld [vmem:[%s813_s3 + $0x8] sm:$0xff] }
   0xe   :  { %290 = vmatpush.bf16.msra.mxu0 %v586_v12  ;;  %v393_v41 = vld [vmem:[%s813_s3 + $0x10] sm:$0xff]  ;;  %v598_v42 = vld [vmem:[%s810_s1 + $0x80] sm:$0xff]  ;;  %v442_v43 = vld [vmem:[%s811_s0 + $0x8] sm:$0xf]  ;;  %v435_v47 = vor.u32 %v576_v36, %v434_v35  ;;  %v439_v48 = vor.u32 %v574_v37, %v436_v39 }
   0xf   :  { %309 = vmatpush.bf16.msra.mxu1 %v594_v13  ;;  %384 = vperm.xlu1 %611, %v366_v26   ;;  %v577_v44 = vld [vmem:[%s811_s0 + $0x14] sm:$0xf0]  ;;  %v579_v45 = vld [vmem:[%s811_s0 + $0x2c] sm:$0xf]  ;;  %v460_v46 = vld [vmem:[%s811_s0 + $0x38] sm:$0xf0] }
  0x10   :  { %328 = vmatpush.bf16.msra.mxu2 %v602_v14  ;;  %572 = vmatmul.msk.bf16.vlgmr.msra.gmra.mxu3 %vm280_vm0, %v447_v23  ;;  %v443_v49 = vor.u32 %v577_v44, %v442_v43  ;;  %v463_v50 = vor.u32 %v579_v45, %v460_v46  ;;  %v450_v51 = vld [vmem:[%s811_s0 + $0x20] sm:$0xf]  ;;  %v580_v52 = vld [vmem:[%s811_s0 + $0x2c] sm:$0xf0]  ;;  %v578_v53 = vld [vmem:[%s811_s0 + $0x24] sm:$0xf] }
  0x11   :  { %374 = vperm.xlu0 %610, %v364_v27   ;;  %v452_v54 = vld [vmem:[%s811_s0 + $0x30] sm:$0xf0]  ;;  %v458_v55 = vld [vmem:[%s811_s0 + $0x28] sm:$0xf]  ;;  %v581_v56 = vld [vmem:[%s811_s0 + $0x34] sm:$0xf0]  ;;  %v451_v57 = vor.u32 %v580_v52, %v450_v51 }
  0x12   :  { %291 = vmatpush.bf16.msra.mxu0 %v585_v20  ;;  %v455_v58 = vor.u32 %v578_v53, %v452_v54  ;;  %v459_v59 = vor.u32 %v581_v56, %v458_v55 }
  0x13   :  { %310 = vmatpush.bf16.msra.mxu1 %v593_v21  ;;  %402 = vperm.xlu2 %612, %v392_v38  }
  0x14   :  { %329 = vmatpush.bf16.msra.mxu2 %v601_v22 }
  0x16   :  { %292 = vmatpush.bf16.msra.mxu0 %v584_v24 }
  0x17   :  { %311 = vmatpush.bf16.msra.mxu1 %v592_v25  ;;  %412 = vperm.xlu1 %611, %v394_v40  }
  0x18   :  { %330 = vmatpush.bf16.msra.mxu2 %v600_v28 }
  0x19   :  { %407 = vperm.xlu0 %610, %v393_v41  }
  0x1a   :  { %293 = vmatpush.bf16.msra.mxu0 %v583_v30 }
  0x1b   :  { %312 = vmatpush.bf16.msra.mxu1 %v591_v31 }
  0x1c   :  { %331 = vmatpush.bf16.msra.mxu2 %v599_v32 }
  0x1e   :  { %294 = vmatpush.bf16.msra.mxu0 %v582_v33 }
  0x1f   :  { %313 = vmatpush.bf16.msra.mxu1 %v590_v34 }
  0x20   :  { %332 = vmatpush.bf16.msra.mxu2 %v598_v42  ;;  %573 = vmatmul.msk.bf16.gmra.mxu3 %vm280_vm0, %v463_v50 }
  0x21   :  { %295 = vmatmul.bf16.vlgmr.msra.gmra.mxu0 %v435_v47 }
  0x22   :  { %314 = vmatmul.bf16.vlgmr.msra.gmra.mxu1 %v439_v48 }
  0x23   :  { %333 = vmatmul.bf16.vlgmr.msra.gmra.mxu2 %v443_v49 }
  0x31   :  { %300 = vmatmul.bf16.gmra.mxu0 %v451_v57 }
  0x32   :  { %319 = vmatmul.bf16.gmra.mxu1 %v455_v58 }
  0x33   :  { %338 = vmatmul.bf16.gmra.mxu2 %v459_v59 }
  0x65   :  { %v398_v5 = vpop.permute.xlu2 %397 }
  0x6d   :  { %v403_v19 = vpop.permute.xlu2 %402 }
  0x79   :  { %v380_v12 = vpop.permute.xlu1 %379 }
  0x7b   :  { %v370_v4 = vpop.permute.xlu0 %369 }
  0x81   :  { %v385_v27 = vpop.permute.xlu1 %384 }
  0x83   :  { %v375_v18 = vpop.permute.xlu0 %374 }
  0x89   :  { %v413_v41 = vpop.permute.xlu1 %412 }
  0x8b   :  { %v408_v32 = vpop.permute.xlu0 %407 }
  0x93   :  { %v353_v62 = vpop.f32.mrf.mxu3 }
  0x9b   :  { %v355_v8 = vpop.f32.mrf.mxu3 }
  0x9e   :  { %v296_v60 = vpop.f32.mrf.mxu0 }
  0x9f   :  { %v315_v61 = vpop.f32.mrf.mxu1 }
  0xa0   :  { %v316_v63 = vadd.f32 %v315_v61, %v296_v60 }
  0xa3   :  { %v358_v23 = vpop.f32.mrf.mxu3 }
  0xa6   :  { %v334_v0 = vpop.f32.mrf.mxu2  ;;  %v298_v2 = vpop.f32.mrf.mxu0 }
  0xa7   :  { %v335_v1 = vadd.f32 %v334_v0, %v316_v63  ;;  %v317_v3 = vpop.f32.mrf.mxu1 }
  0xa8   :  { %v318_v9 = vadd.f32 %v317_v3, %v298_v2 }
  0xa9   :  { %v354_v6 = vadd.f32 %v353_v62, %v335_v1 }
  0xab   :  { %v387_v7 = vmul.f32 %v370_v4, %v354_v6  ;;  %v360_v38 = vpop.f32.mrf.mxu3 }
  0xad   :  { %v415_v10 = vadd.f32 %v398_v5, %v387_v7 }
  0xae   :  { %v336_v11 = vpop.f32.mrf.mxu2  ;;  %v301_v15 = vpop.f32.mrf.mxu0 }
  0xaf   :  { %v419_v13 = vmax.f32 %v415_v10, 0.0  ;;  %v337_v14 = vadd.f32 %v336_v11, %v318_v9  ;;  %v320_v16 = vpop.f32.mrf.mxu1 }
  0xb0   :  { %v321_v20 = vadd.f32 %v320_v16, %v301_v15 }
  0xb1   :  { %424 = vst.msk [vmem:[%s814_s4] sm:$0xff] %vm423_vm1, %v419_v13  ;;  %v356_v17 = vadd.f32 %v355_v8, %v337_v14 }
  0xb3   :  { %v388_v21 = vmul.f32 %v375_v18, %v356_v17 }
  0xb5   :  { %v416_v22 = vadd.f32 %v403_v19, %v388_v21 }
  0xb6   :  { %v339_v24 = vpop.f32.mrf.mxu2  ;;  %v303_v29 = vpop.f32.mrf.mxu0 }
  0xb7   :  { %v420_v25 = vmax.f32 %v416_v22, 0.0  ;;  %v340_v26 = vadd.f32 %v339_v24, %v321_v20  ;;  %v322_v30 = vpop.f32.mrf.mxu1 }
  0xb8   :  { %v323_v34 = vadd.f32 %v322_v30, %v303_v29 }
  0xb9   :  { %425 = vst.msk [vmem:[%s814_s4 + $0x8] sm:$0xff] %vm423_vm1, %v420_v25  ;;  %v359_v28 = vadd.f32 %v358_v23, %v340_v26 }
  0xbb   :  { %v389_v31 = vmul.f32 %v380_v12, %v359_v28 }
  0xbd   :  { %v417_v33 = vadd.f32 %v408_v32, %v389_v31 }
  0xbe   :  { %v341_v35 = vpop.f32.mrf.mxu2 }
  0xbf   :  { %v421_v36 = vmax.f32 %v417_v33, 0.0  ;;  %v342_v37 = vadd.f32 %v341_v35, %v323_v34 }
  0xc1   :  { %426 = vst.msk [vmem:[%s814_s4 + $0x10] sm:$0xff] %vm423_vm1, %v421_v36  ;;  %v361_v39 = vadd.f32 %v360_v38, %v342_v37 }
  0xc3   :  { %v390_v40 = vmul.f32 %v385_v27, %v361_v39 }
  0xc5   :  { %v418_v42 = vadd.f32 %v413_v41, %v390_v40 }
  0xc7   :  { %v422_v43 = vmax.f32 %v418_v42, 0.0 }
  0xc9   :  { %427 = vst.msk [vmem:[%s814_s4 + $0x18] sm:$0xff] %vm423_vm1, %v422_v43 }

// kernel: resnet3d_vtp_forward.17
= control target key start
LH: loop header
LB: loop body
LE: loop exit
PB: predicated region body
PF: predicated region fallthrough
CT: control target
= control target key end

     0   :  { %vm38_vm0 = vcmask 257024   ;;  %s818_s0 = inlined_call_operand.vmem [shape: f32[8,4,32], index: 0, kind: input, shape index: {}]   ;;  %s819_s1 = inlined_call_operand.vmem [shape: f32[1,1,32], index: 1, kind: input, shape index: {}]   ;;  %s820_s2 = inlined_call_operand.vmem [shape: f32[32,10], index: 2, kind: input, shape index: {}]   ;;  %s821_s3 = inlined_call_operand.vmem [shape: f32[1,10], index: 3, kind: input, shape index: {}]   ;;  %s822_s4 = inlined_call_operand.hbm [shape: f32[8,10], index: 4, kind: output, shape index: {}]  }
   0x1   :  { %v554_v0 = vld [vmem:[%s818_s0 + $0x10] sm:$0xf]  ;;  %v465_v1 = vld [vmem:[%s819_s1] ss:$0 sm:$0xff]  ;;  %v562_v2 = vld [vmem:[%s818_s0 + $0x8] sm:$0xf] }
   0x2   :  { %v567_v3 = vld [vmem:[%s818_s0] sm:$0xf]  ;;  %v34_v4 = vmul.f32 %v465_v1, %v554_v0  ;;  %v32_v5 = vmul.f32 %v465_v1, %v562_v2  ;;  %v575_v7 = vld [vmem:[%s818_s0 + $0x14] sm:$0xf]  ;;  %v580_v8 = vld [vmem:[%s818_s0 + $0xc] sm:$0xf] }
   0x3   :  { %v30_v6 = vmul.f32 %v465_v1, %v567_v3  ;;  %v585_v9 = vld [vmem:[%s818_s0 + $0x4] sm:$0xf] }
   0x4   :  { %v51_v10 = vsel %vm38_vm0, %v34_v4, 0.0  ;;  %v45_v11 = vsel %vm38_vm0, %v32_v5, 0.0 }
   0x5   :  { %v39_v12 = vsel %vm38_vm0, %v30_v6, 0.0 }
   0x6   :  { %9 = vsyncpa [#allocation3], 0  ;;  %52 = vadd.xlane.f32.xlu2 %v51_v10  ;;  %46 = vadd.xlane.f32.xlu1 %v45_v11  ;;  %v35_v13 = vmul.f32 %v465_v1, %v575_v7  ;;  %v33_v14 = vmul.f32 %v465_v1, %v580_v8  ;;  %v31_v15 = vmul.f32 %v465_v1, %v585_v9  ;;  %v599_v19 = vld [vmem:[%s818_s0 + $0x1c] sm:$0xf]  ;;  %v604_v20 = vld [vmem:[%s818_s0 + $0x18] sm:$0xf] }
   0x7   :  { %40 = vadd.xlane.f32.xlu0 %v39_v12  ;;  %v37_v21 = vmul.f32 %v465_v1, %v599_v19  ;;  %v36_v22 = vmul.f32 %v465_v1, %v604_v20  ;;  %vm63_vm1 = vcmask 1043456   ;;  %s525_s14 = smov [#allocation2]   ;;  %s454_s18 = sshll.u32 %s822_s4, 4  ;;  %s455_s18 = int_to_ptr.hbm [resolvable:$true] %s454_s18 }
   0x8   :  { %v54_v16 = vsel %vm38_vm0, %v35_v13, 0.0  ;;  %v48_v17 = vsel %vm38_vm0, %v33_v14, 0.0  ;;  %v42_v18 = vsel %vm38_vm0, %v31_v15, 0.0  ;;  %s452_s15 = sshll.u32 %s525_s14, 4  ;;  %s453_s15 = int_to_ptr.vmem [resolvable:$true] %s452_s15 }
   0x9   :  { %v60_v23 = vsel %vm38_vm0, %v37_v21, 0.0  ;;  %v57_v24 = vsel %vm38_vm0, %v36_v22, 0.0 }
   0xe   :  { %55 = vadd.xlane.f32.xlu2 %v54_v16  ;;  %49 = vadd.xlane.f32.xlu1 %v48_v17 }
   0xf   :  { %43 = vadd.xlane.f32.xlu0 %v42_v18 }
  0x16   :  { %61 = vadd.xlane.f32.xlu1 %v60_v23 }
  0x17   :  { %58 = vadd.xlane.f32.xlu0 %v57_v24 }
  0x79   :  { %v53_v25 = vpop.xlane.xlu2 %52  ;;  %v47_v26 = vpop.xlane.xlu1 %46 }
  0x7a   :  { %v92_v27 = vsel %vm63_vm1, %v53_v25, -inf  ;;  %v78_v28 = vsel %vm63_vm1, %v47_v26, -inf  ;;  %v41_v29 = vpop.xlane.xlu0 %40 }
  0x7b   :  { %v93_v30 = vrot.slane %v92_v27, 4  ;;  %v79_v31 = vrot.slane %v78_v28, 4  ;;  %v64_v32 = vsel %vm63_vm1, %v41_v29, -inf }
  0x7c   :  { %v65_v33 = vrot.slane %v64_v32, 4 }
  0x7d   :  { %v94_v34 = vmax.f32 %v92_v27, %v93_v30  ;;  %v80_v35 = vmax.f32 %v78_v28, %v79_v31 }
  0x7e   :  { %v66_v36 = vmax.f32 %v64_v32, %v65_v33 }
  0x7f   :  { %v95_v37 = vrot.slane %v94_v34, 2  ;;  %v81_v38 = vrot.slane %v80_v35, 2 }
  0x80   :  { %v67_v39 = vrot.slane %v66_v36, 2 }
  0x81   :  { %v96_v40 = vmax.f32 %v94_v34, %v95_v37  ;;  %v82_v41 = vmax.f32 %v80_v35, %v81_v38  ;;  %v56_v42 = vpop.xlane.xlu2 %55  ;;  %v50_v43 = vpop.xlane.xlu1 %49 }
  0x82   :  { %v68_v44 = vmax.f32 %v66_v36, %v67_v39  ;;  %v99_v45 = vsel %vm63_vm1, %v56_v42, -inf  ;;  %v85_v46 = vsel %vm63_vm1, %v50_v43, -inf  ;;  %v44_v47 = vpop.xlane.xlu0 %43 }
  0x83   :  { %v97_v48 = vrot.slane %v96_v40, 1  ;;  %v83_v49 = vrot.slane %v82_v41, 1  ;;  %v100_v50 = vrot.slane %v99_v45, 4  ;;  %v86_v51 = vrot.slane %v85_v46, 4 }
  0x84   :  { %v69_v52 = vrot.slane %v68_v44, 1  ;;  %v71_v53 = vsel %vm63_vm1, %v44_v47, -inf }
  0x85   :  { %v98_v54 = vmax.f32 %v96_v40, %v97_v48  ;;  %v84_v55 = vmax.f32 %v82_v41, %v83_v49  ;;  %v101_v56 = vmax.f32 %v99_v45, %v100_v50  ;;  %v87_v57 = vmax.f32 %v85_v46, %v86_v51 }
  0x86   :  { %v70_v58 = vmax.f32 %v68_v44, %v69_v52  ;;  %v72_v59 = vrot.slane %v71_v53, 4 }
  0x87   :  { %v124_v60 = vsub.f32 %v53_v25, %v98_v54  ;;  %v122_v61 = vsub.f32 %v47_v26, %v84_v55  ;;  %v102_v62 = vrot.slane %v101_v56, 2  ;;  %v88_v63 = vrot.slane %v87_v57, 2 }
  0x88   :  { %v120_v1 = vsub.f32 %v41_v29, %v70_v58  ;;  %v73_v4 = vmax.f32 %v71_v53, %v72_v59 }
  0x89   :  { %v136_v5 = vmul.f32 1.442695, %v124_v60  ;;  %v132_v6 = vmul.f32 1.442695, %v122_v61  ;;  %v103_v10 = vmax.f32 %v101_v56, %v102_v62  ;;  %v89_v11 = vmax.f32 %v87_v57, %v88_v63  ;;  %v62_v12 = vpop.xlane.xlu1 %61 }
  0x8a   :  { %v128_v13 = vmul.f32 1.442695, %v120_v1  ;;  %v74_v14 = vrot.slane %v73_v4, 2  ;;  %v113_v15 = vsel %vm63_vm1, %v62_v12, -inf  ;;  %v617_v16 = vpop.xlane.xlu0 %58 }
  0x8b   :  { %467 = vpow2.f32 %v136_v5  ;;  %v104_v17 = vrot.slane %v103_v10, 1  ;;  %v90_v18 = vrot.slane %v89_v11, 1  ;;  %v114_v21 = vrot.slane %v113_v15, 4 }
  0x8c   :  { %469 = vpow2.f32 %v132_v6  ;;  %v75_v22 = vmax.f32 %v73_v4, %v74_v14  ;;  %v106_v23 = vsel %vm63_vm1, %v617_v16, -inf }
  0x8d   :  { %471 = vpow2.f32 %v128_v13  ;;  %v105_v24 = vmax.f32 %v103_v10, %v104_v17  ;;  %v91_v25 = vmax.f32 %v89_v11, %v90_v18  ;;  %v115_v26 = vmax.f32 %v113_v15, %v114_v21 }
  0x8e   :  { %v76_v27 = vrot.slane %v75_v22, 1  ;;  %v107_v28 = vrot.slane %v106_v23, 4 }
  0x8f   :  { %v125_v29 = vsub.f32 %v56_v42, %v105_v24  ;;  %v123_v30 = vsub.f32 %v50_v43, %v91_v25  ;;  %v116_v31 = vrot.slane %v115_v26, 2 }
  0x90   :  { %v77_v32 = vmax.f32 %v75_v22, %v76_v27  ;;  %v108_v40 = vmax.f32 %v106_v23, %v107_v28 }
  0x91   :  { %v621_v33 = vpop.eup %467  ;;  %v138_v34 = vmul.f32 1.442695, %v125_v29  ;;  %v134_v35 = vmul.f32 1.442695, %v123_v30  ;;  %v117_v36 = vmax.f32 %v115_v26, %v116_v31 }
  0x92   :  { %v623_v37 = vpop.eup %469  ;;  %v172_v38 = vsel %vm63_vm1, %v621_v33, 0.0  ;;  %v121_v39 = vsub.f32 %v44_v47, %v77_v32  ;;  %v109_v47 = vrot.slane %v108_v40, 2 }
  0x93   :  { %v627_v41 = vpop.eup %471  ;;  %v173_v44 = vrot.slane %v172_v38, 4  ;;  %v158_v42 = vsel %vm63_vm1, %v623_v37, 0.0  ;;  %473 = vpow2.f32 %v138_v34  ;;  %v118_v43 = vrot.slane %v117_v36, 1 }
  0x94   :  { %v159_v45 = vrot.slane %v158_v42, 4  ;;  %v144_v46 = vsel %vm63_vm1, %v627_v41, 0.0  ;;  %475 = vpow2.f32 %v134_v35  ;;  %v130_v48 = vmul.f32 1.442695, %v121_v39 }
  0x95   :  { %v174_v49 = vadd.f32 %v173_v44, %v172_v38  ;;  %v145_v50 = vrot.slane %v144_v46, 4  ;;  %v119_v51 = vmax.f32 %v117_v36, %v118_v43  ;;  %v110_v1 = vmax.f32 %v108_v40, %v109_v47 }
  0x96   :  { %v160_v52 = vadd.f32 %v159_v45, %v158_v42  ;;  %477 = vpow2.f32 %v130_v48 }
  0x97   :  { %v175_v53 = vrot.slane %v174_v49, 2  ;;  %v146_v54 = vadd.f32 %v145_v50, %v144_v46  ;;  %v127_v55 = vsub.f32 %v62_v12, %v119_v51  ;;  %v111_v24 = vrot.slane %v110_v1, 1 }
  0x98   :  { %v161_v56 = vrot.slane %v160_v52, 2 }
  0x99   :  { %v633_v57 = vpop.eup %473  ;;  %v176_v58 = vadd.f32 %v175_v53, %v174_v49  ;;  %v147_v59 = vrot.slane %v146_v54, 2  ;;  %v142_v60 = vmul.f32 1.442695, %v127_v55  ;;  %v112_v30 = vmax.f32 %v110_v1, %v111_v24 }
  0x9a   :  { %v635_v61 = vpop.eup %475  ;;  %v162_v62 = vadd.f32 %v161_v56, %v160_v52  ;;  %v179_v63 = vsel %vm63_vm1, %v633_v57, 0.0 }
  0x9b   :  { %v177_v4 = vrot.slane %v176_v58, 1  ;;  %v148_v5 = vadd.f32 %v147_v59, %v146_v54  ;;  %v180_v6 = vrot.slane %v179_v63, 4  ;;  %v165_v10 = vsel %vm63_vm1, %v635_v61, 0.0 }
  0x9c   :  { %v641_v11 = vpop.eup %477  ;;  %v163_v12 = vrot.slane %v162_v62, 1  ;;  %v166_v13 = vrot.slane %v165_v10, 4  ;;  %479 = vpow2.f32 %v142_v60  ;;  %v126_v48 = vsub.f32 %v617_v16, %v112_v30 }
  0x9d   :  { %v149_v14 = vrot.slane %v148_v5, 1  ;;  %v181_v15 = vadd.f32 %v180_v6, %v179_v63  ;;  %v151_v17 = vsel %vm63_vm1, %v641_v11, 0.0  ;;  %v645_v18 = vadd.f32 %v177_v4, %v176_v58 }
  0x9e   :  { %v647_v21 = vadd.f32 %v163_v12, %v162_v62  ;;  %v167_v22 = vadd.f32 %v166_v13, %v165_v10  ;;  %v152_v23 = vrot.slane %v151_v17, 4  ;;  %v140_v55 = vmul.f32 1.442695, %v126_v48 }
  0x9f   :  { %v650_v25 = vadd.f32 %v149_v14, %v148_v5  ;;  %v182_v26 = vrot.slane %v181_v15, 2  ;;  %v271_v63 = vand.u32 2147483648, %v645_v18  ;;  %vm265_vm5 = vweird.f32 %v645_v18 }
  0xa0   :  { %481 = vrcp.f32 %v647_v21  ;;  %v168_v28 = vrot.slane %v167_v22, 2  ;;  %v153_v29 = vadd.f32 %v152_v23, %v151_v17  ;;  %v239_v1 = vand.u32 2147483647, %v647_v21 }
  0xa1   :  { %483 = vrcp.f32 %v645_v18  ;;  %v183_v31 = vadd.f32 %v182_v26, %v181_v15  ;;  %v241_v4 = vand.u32 2147483648, %v647_v21  ;;  %vm205_vm4 = vweird.f32 %v650_v25 }
  0xa2   :  { %v652_v27 = vpop.eup %479  ;;  %485 = vrcp.f32 %v650_v25  ;;  %v169_v32 = vadd.f32 %v168_v28, %v167_v22  ;;  %v154_v34 = vrot.slane %v153_v29, 2  ;;  %v209_v10 = vand.u32 2147483647, %v650_v25 }
  0xa3   :  { %v193_v35 = vsel %vm63_vm1, %v652_v27, 0.0  ;;  %v184_v38 = vrot.slane %v183_v31, 1  ;;  %v211_v12 = vand.u32 2147483648, %v650_v25  ;;  %v269_v23 = vand.u32 2147483647, %v645_v18 }
  0xa4   :  { %v170_v39 = vrot.slane %v169_v32, 1  ;;  %v155_v44 = vadd.f32 %v154_v34, %v153_v29  ;;  %v194_v42 = vrot.slane %v193_v35, 4  ;;  %vm235_vm6 = vweird.f32 %v647_v21 }
  0xa5   :  { %v664_v45 = vadd.f32 %v184_v38, %v183_v31  ;;  %vm703_vm8 = vcmp.eq.f32.partialorder %v239_v1, 8.507059e+37  ;;  %v242_v31 = vor.u32 1.1754944e-38, %v241_v4  ;;  %vm210_vm11 = vcmp.eq.f32.partialorder %v209_v10, 8.507059e+37 }
  0xa6   :  { %v658_v36 = vpop.eup %481  ;;  %v666_v46 = vadd.f32 %v170_v39, %v169_v32  ;;  %v156_v51 = vrot.slane %v155_v44, 1  ;;  %v195_v47 = vadd.f32 %v194_v42, %v193_v35  ;;  %v212_v32 = vor.u32 1.1754944e-38, %v211_v12 }
  0xa7   :  { %v231_v40 = vmul.f32 %v658_v36, %v647_v21  ;;  %v662_v43 = vpop.eup %483  ;;  %487 = vrcp.f32 %v664_v45  ;;  %vm236_vm3 = vweird.f32 %v658_v36  ;;  %v286_v4 = vand.u32 2147483648, %v664_v45 }
  0xa8   :  { %v486_v49 = vpop.eup %485  ;;  %v261_v53 = vmul.f32 %v662_v43, %v645_v18  ;;  %489 = vrcp.f32 %v666_v46  ;;  %v674_v58 = vadd.f32 %v156_v51, %v155_v44  ;;  %v196_v59 = vrot.slane %v195_v47, 2  ;;  %vm714_vm10 = vmor %vm235_vm6, %vm236_vm3 }
  0xa9   :  { %v201_v50 = vmul.f32 %v486_v49, %v650_v25  ;;  %v232_v52 = vsub.f32 1.0, %v231_v40  ;;  %491 = vpow2.f32 %v140_v55  ;;  %vm206_vm2 = vweird.f32 %v486_v49 }
  0xaa   :  { %v262_v62 = vsub.f32 1.0, %v261_v53  ;;  %493 = vrcp.f32 %v674_v58  ;;  %v197_v17 = vadd.f32 %v196_v59, %v195_v47  ;;  %vm699_vm7 = vmor %vm205_vm4, %vm206_vm2  ;;  %v272_v25 = vor.u32 1.1754944e-38, %v271_v63 }
  0xab   :  { %v202_v54 = vsub.f32 1.0, %v201_v50  ;;  %v233_v16 = vmul.f32 %v658_v36, %v232_v52  ;;  %vm266_vm9 = vweird.f32 %v662_v43  ;;  %vm250_vm13 = vweird.f32 %v666_v46 }
  0xac   :  { %v263_v22 = vmul.f32 %v662_v43, %v262_v62  ;;  %v198_v40 = vrot.slane %v197_v17, 1  ;;  %v256_v50 = vand.u32 2147483648, %v666_v46  ;;  %v254_v52 = vand.u32 2147483647, %v666_v46  ;;  %vm747_vm15 = vmor %vm265_vm5, %vm266_vm9 }
  0xad   :  { %v203_v56 = vmul.f32 %v486_v49, %v202_v54  ;;  %v677_v60 = vpop.eup %487  ;;  %v234_v13 = vadd.f32 %v658_v36, %v233_v16  ;;  %v224_v53 = vand.u32 2147483647, %v674_v58  ;;  %v226_v16 = vand.u32 2147483648, %v674_v58 }
  0xae   :  { %v683_v6 = vpop.eup %489  ;;  %v276_v14 = vmul.f32 %v677_v60, %v664_v45  ;;  %v264_v44 = vadd.f32 %v662_v43, %v263_v22  ;;  %v741_v59 = vadd.f32 %v198_v40, %v197_v17  ;;  %vm255_vm2 = vcmp.eq.f32.partialorder %v254_v52, 8.507059e+37  ;;  %v394_v22 = vld [vmem:[%s820_s2 + $0x10] sm:$0xff] }
  0xaf   :  { %v204_v5 = vadd.f32 %v486_v49, %v203_v56  ;;  %v246_v15 = vmul.f32 %v683_v6, %v666_v46  ;;  %v709_v30 = vpop.eup %491  ;;  %v238_v35 = vsel %vm714_vm10, %v658_v36, %v234_v13  ;;  %vm251_vm12 = vweird.f32 %v683_v6 }
  0xb0   :  { %v494_v34 = vpop.eup %493  ;;  %v277_v38 = vsub.f32 1.0, %v276_v14  ;;  %v186_v36 = vsel %vm63_vm1, %v709_v30, 0.0  ;;  %v243_v51 = vsel %vm703_vm8, %v242_v31, %v238_v35  ;;  %vm736_vm14 = vmor %vm250_vm13, %vm251_vm12  ;;  %v268_v1 = vsel %vm747_vm15, %v662_v43, %v264_v44 }
  0xb1   :  { %v208_v28 = vsel %vm699_vm7, %v486_v49, %v204_v5  ;;  %v247_v29 = vsub.f32 1.0, %v246_v15  ;;  %v216_v48 = vmul.f32 %v494_v34, %v674_v58  ;;  %vm221_vm1 = vweird.f32 %v494_v34 }
  0xb2   :  { %v213_v42 = vsel %vm210_vm11, %v212_v32, %v208_v28  ;;  %v278_v55 = vmul.f32 %v677_v60, %v277_v38  ;;  %v187_v63 = vrot.slane %v186_v36, 4  ;;  %v257_v5 = vor.u32 1.1754944e-38, %v256_v50 }
  0xb3   :  { %v248_v39 = vmul.f32 %v683_v6, %v247_v29  ;;  %v217_v47 = vsub.f32 1.0, %v216_v48  ;;  %v214_v54 = vmul.f32 %v627_v41, %v213_v42  ;;  %495 = vrcp.f32 %v741_v59 }
  0xb4   :  { %v244_v18 = vmul.f32 %v623_v37, %v243_v51  ;;  %vm220_vm3 = vweird.f32 %v674_v58  ;;  %vm281_vm4 = vweird.f32 %v677_v60  ;;  %v227_v13 = vor.u32 1.1754944e-38, %v226_v16  ;;  %v395_v58 = vld [vmem:[%s820_s2 + $0x18] sm:$0xff] }
  0xb5   :  { %v249_v49 = vadd.f32 %v683_v6, %v248_v39  ;;  %v218_v62 = vmul.f32 %v494_v34, %v217_v47  ;;  %vm222_vm5 = vmor %vm220_vm3, %vm221_vm1  ;;  %v320_v43 = vmul.f32 %v214_v54, %v567_v3  ;;  %vm225_vm6 = vcmp.eq.f32.partialorder %v224_v53, 8.507059e+37  ;;  %437 = vmatpush.msra.mxu0 %v395_v58 }
  0xb6   :  { %v188_v15 = vadd.f32 %v187_v63, %v186_v36  ;;  %vm270_vm7 = vcmp.eq.f32.partialorder %v269_v23, 8.507059e+37  ;;  %vm280_vm8 = vweird.f32 %v664_v45  ;;  %v284_v37 = vand.u32 2147483647, %v664_v45 }
  0xb7   :  { %v253_v41 = vsel %vm736_vm14, %v683_v6, %v249_v49  ;;  %v219_v10 = vadd.f32 %v494_v34, %v218_v62  ;;  %v279_v6 = vadd.f32 %v677_v60, %v278_v55  ;;  %v273_v24 = vsel %vm270_vm7, %v272_v25, %v268_v1  ;;  %vm774_vm9 = vmor %vm280_vm8, %vm281_vm4  ;;  %v393_v25 = vld [vmem:[%s820_s2 + $0x8] sm:$0xff]  ;;  %438 = vmatpush.msra.mxu0 %v394_v22 }
  0xb8   :  { %v258_v12 = vsel %vm255_vm2, %v257_v5, %v253_v41  ;;  %v189_v26 = vrot.slane %v188_v15, 2  ;;  %v287_v21 = vor.u32 1.1754944e-38, %v286_v4  ;;  %v322_v31 = vmul.f32 %v244_v18, %v562_v2 }
  0xb9   :  { %v223_v14 = vsel %vm222_vm5, %v494_v34, %v219_v10  ;;  %v259_v23 = vmul.f32 %v635_v61, %v258_v12  ;;  %v496_v28 = vpop.eup %495  ;;  %v283_v29 = vsel %vm774_vm9, %v677_v60, %v279_v6  ;;  %v328_v32 = vsel %vm38_vm0, %v320_v43, 0.0  ;;  %v392_v60 = vld [vmem:[%s820_s2] sm:$0xff]  ;;  %439 = vmatpush.msra.mxu0 %v393_v25 }
  0xba   :  { %v228_v17 = vsel %vm225_vm6, %v227_v13, %v223_v14  ;;  %v274_v34 = vmul.f32 %v621_v33, %v273_v24  ;;  %vm285_vm10 = vcmp.eq.f32.partialorder %v284_v37, 8.507059e+37  ;;  %v190_v35 = vadd.f32 %v189_v26, %v188_v15 }
  0xbb   :  { %v229_v45 = vmul.f32 %v641_v11, %v228_v17  ;;  %v306_v11 = vmul.f32 %v496_v28, %v741_v59  ;;  %v288_v38 = vsel %vm285_vm10, %v287_v21, %v283_v29  ;;  %v323_v39 = vmul.f32 %v259_v23, %v580_v8  ;;  %440 = vmatpush.msra.mxu0 %v392_v60 }
  0xbc   :  { %v329_v44 = vrot.slane %v328_v32, 4  ;;  %v316_v42 = vand.u32 2147483648, %v741_v59  ;;  %v191_v48 = vrot.slane %v190_v35, 1  ;;  %v342_v33 = vsel %vm38_vm0, %v322_v31, 0.0 }
  0xbd   :  { %v321_v61 = vmul.f32 %v229_v45, %v585_v9  ;;  %v307_v40 = vsub.f32 1.0, %v306_v11  ;;  %vm311_vm11 = vweird.f32 %v496_v28  ;;  %v314_v50 = vand.u32 2147483647, %v741_v59 }
  0xbe   :  { %v324_v36 = vmul.f32 %v274_v34, %v554_v0  ;;  %v289_v8 = vmul.f32 %v633_v57, %v288_v38  ;;  %v192_v51 = vadd.f32 %v191_v48, %v190_v35  ;;  %v349_v52 = vsel %vm38_vm0, %v323_v39, 0.0 }
  0xbf   :  { %v335_v2 = vsel %vm38_vm0, %v321_v61, 0.0  ;;  %v308_v49 = vmul.f32 %v496_v28, %v307_v40  ;;  %vm310_vm12 = vweird.f32 %v741_v59  ;;  %v343_v54 = vrot.slane %v342_v33, 4 }
  0xc0   :  { %v336_v9 = vrot.slane %v335_v2, 4  ;;  %v330_v55 = vadd.f32 %v329_v44, %v328_v32  ;;  %vm312_vm13 = vmor %vm310_vm12, %vm311_vm11  ;;  %v317_v56 = vor.u32 1.1754944e-38, %v316_v42  ;;  %497 = vrcp.f32 %v192_v51 }
  0xc1   :  { %v309_v53 = vadd.f32 %v496_v28, %v308_v49  ;;  %vm315_vm14 = vcmp.eq.f32.partialorder %v314_v50, 8.507059e+37  ;;  %v325_v46 = vmul.f32 %v289_v8, %v575_v7  ;;  %v350_v41 = vrot.slane %v349_v52, 4 }
  0xc2   :  { %v337_v47 = vadd.f32 %v336_v9, %v335_v2  ;;  %v356_v57 = vsel %vm38_vm0, %v324_v36, 0.0  ;;  %v344_v1 = vadd.f32 %v343_v54, %v342_v33  ;;  %v331_v4 = vrot.slane %v330_v55, 2 }
  0xc3   :  { %v313_v16 = vsel %vm312_vm13, %v496_v28, %v309_v53  ;;  %v357_v18 = vrot.slane %v356_v57, 4  ;;  %v363_v10 = vsel %vm38_vm0, %v325_v46, 0.0  ;;  %v351_v6 = vadd.f32 %v350_v41, %v349_v52 }
  0xc4   :  { %v318_v0 = vsel %vm315_vm14, %v317_v56, %v313_v16  ;;  %v338_v62 = vrot.slane %v337_v47, 2  ;;  %v345_v43 = vrot.slane %v344_v1, 2  ;;  %v332_v14 = vadd.f32 %v331_v4, %v330_v55 }
  0xc5   :  { %v319_v63 = vmul.f32 %v652_v27, %v318_v0  ;;  %v364_v15 = vrot.slane %v363_v10, 4  ;;  %v358_v58 = vadd.f32 %v357_v18, %v356_v57  ;;  %v352_v27 = vrot.slane %v351_v6, 2 }
  0xc6   :  { %v498_v5 = vpop.eup %497  ;;  %v339_v12 = vadd.f32 %v338_v62, %v337_v47  ;;  %v301_v22 = vand.u32 2147483648, %v192_v51  ;;  %v346_v23 = vadd.f32 %v345_v43, %v344_v1  ;;  %v333_v45 = vrot.slane %v332_v14, 1 }
  0xc7   :  { %v327_v59 = vmul.f32 %v319_v63, %v599_v19  ;;  %v291_v13 = vmul.f32 %v498_v5, %v192_v51  ;;  %vm296_vm15 = vweird.f32 %v498_v5  ;;  %v299_v19 = vand.u32 2147483647, %v192_v51 }
  0xc8   :  { %v340_v24 = vrot.slane %v339_v12, 1  ;;  %v365_v26 = vadd.f32 %v364_v15, %v363_v10  ;;  %vm295_vm1 = vweird.f32 %v192_v51  ;;  %v359_v21 = vrot.slane %v358_v58, 2 }
  0xc9   :  { %v377_v7 = vsel %vm38_vm0, %v327_v59, 0.0  ;;  %v292_v37 = vsub.f32 1.0, %v291_v13  ;;  %vm297_vm2 = vmor %vm295_vm1, %vm296_vm15  ;;  %v302_v25 = vor.u32 1.1754944e-38, %v301_v22  ;;  %v353_v31 = vadd.f32 %v352_v27, %v351_v6  ;;  %v466_v13 = vld [vmem:[%s821_s3] ss:$0 sm:$0xff] }
  0xca   :  { %v378_v17 = vrot.slane %v377_v7, 4  ;;  %v341_v32 = vadd.f32 %v340_v24, %v339_v12  ;;  %vm300_vm3 = vcmp.eq.f32.partialorder %v299_v19, 8.507059e+37  ;;  %v347_v11 = vrot.slane %v346_v23, 1 }
  0xcb   :  { %v293_v3 = vmul.f32 %v498_v5, %v292_v37  ;;  %v334_v35 = vadd.f32 %v333_v45, %v332_v14  ;;  %v366_v38 = vrot.slane %v365_v26, 2  ;;  %v360_v2 = vadd.f32 %v359_v21, %v358_v58 }
  0xcc   :  { %v379_v29 = vadd.f32 %v378_v17, %v377_v7  ;;  %v385_v40 = vmul.f32 0.25, %v341_v32  ;;  %v354_v9 = vrot.slane %v353_v31, 1  ;;  %v348_v42 = vadd.f32 %v347_v11, %v346_v23 }
  0xcd   :  { %v294_v28 = vadd.f32 %v498_v5, %v293_v3  ;;  %vm408_vm4 = vcmask 1041409   ;;  %v384_v48 = vmul.f32 0.25, %v334_v35  ;;  %v367_v49 = vadd.f32 %v366_v38, %v365_v26 }
  0xce   :  { %v380_v39 = vrot.slane %v379_v29, 2  ;;  %v361_v8 = vrot.slane %v360_v2, 1  ;;  %v355_v51 = vadd.f32 %v354_v9, %v353_v31  ;;  %vm410_vm5 = vcmask 1042434  }
  0xcf   :  { %v298_v61 = vsel %vm297_vm2, %v498_v5, %v294_v28  ;;  %v409_v52 = vsel %vm408_vm4, %v385_v40, %v384_v48  ;;  %v386_v47 = vmul.f32 0.25, %v348_v42  ;;  %v368_v53 = vrot.slane %v367_v49, 1 }
  0xd0   :  { %v303_v34 = vsel %vm300_vm3, %v302_v25, %v298_v61  ;;  %v381_v50 = vadd.f32 %v380_v39, %v379_v29  ;;  %v362_v55 = vadd.f32 %v361_v8, %v360_v2  ;;  %vm412_vm6 = vcmask 1043459  }
  0xd1   :  { %v304_v60 = vmul.f32 %v709_v30, %v303_v34  ;;  %v387_v16 = vmul.f32 0.25, %v355_v51  ;;  %v369_v41 = vadd.f32 %v368_v53, %v367_v49  ;;  %vm416_vm7 = vcmask 1045509  }
  0xd2   :  { %v382_v54 = vrot.slane %v381_v50, 1  ;;  %v388_v63 = vmul.f32 0.25, %v362_v55  ;;  %vm418_vm8 = vcmask 1046534   ;;  %vm420_vm9 = vcmask 1047559  }
  0xd3   :  { %v326_v44 = vmul.f32 %v304_v60, %v604_v20  ;;  %v411_v20 = vsel %vm410_vm5, %v386_v47, %v409_v52  ;;  %v389_v59 = vmul.f32 0.25, %v369_v41  ;;  %vm422_vm10 = vcmask 261120  }
  0xd4   :  { %v383_v0 = vadd.f32 %v382_v54, %v381_v50  ;;  %v413_v57 = vsel %vm412_vm6, %v387_v16, %v411_v20  ;;  %vm445_vm11 = vcmask 80896  }
  0xd5   :  { %v370_v33 = vsel %vm38_vm0, %v326_v44, 0.0  ;;  %vm414_vm0 = vcmask 1044484  }
  0xd6   :  { %v371_v36 = vrot.slane %v370_v33, 4  ;;  %v415_v4 = vsel %vm414_vm0, %v388_v63, %v413_v57  ;;  %v391_v5 = vmul.f32 0.25, %v383_v0 }
  0xd7   :  { %v417_v10 = vsel %vm416_vm7, %v389_v59, %v415_v4 }
  0xd8   :  { %v372_v30 = vadd.f32 %v371_v36, %v370_v33 }
  0xda   :  { %v373_v56 = vrot.slane %v372_v30, 2 }
  0xdc   :  { %v374_v46 = vadd.f32 %v373_v56, %v372_v30 }
  0xde   :  { %v375_v62 = vrot.slane %v374_v46, 1 }
  0xe0   :  { %v376_v1 = vadd.f32 %v375_v62, %v374_v46 }
  0xe2   :  { %v390_v18 = vmul.f32 0.25, %v376_v1 }
  0xe4   :  { %v419_v6 = vsel %vm418_vm8, %v390_v18, %v417_v10 }
  0xe5   :  { %v421_v12 = vsel %vm420_vm9, %v391_v5, %v419_v6 }
  0xe6   :  { %463 = vmatmul.msk.f32.vlgmr.msra.gmra.mxu0 %vm422_vm10, %v421_v12 }
 0x163   :  { %v442_v7 = vpop.f32.mrf.mxu0 }
 0x164   :  { %v443_v43 = vadd.f32 %v466_v13, %v442_v7 }
 0x166   :  { %446 = vst.msk [vmem:[#allocation2] sm:$0xff] %vm445_vm11, %v443_v43 }
 0x167   :  { %457 = dma.vmem_to_hbm [thread:$0]  %s453_s15, 128, %s455_s18, [#allocation3]  }
 0x168   :  { %523 = dma.done.wait [#allocation3], 128  }
 0x169   :  { %524 = vsyncadd [#allocation3], 4294967168 }
 0x16a   :  { %462 = vsyncpa [#allocation3], 1 }

</bundles_post_ra>
